<compile_context>
chip_gen: v7x
topology: tpu7x:2x2x1
jax: 0.10.0
libtpu: 0.0.40
codegen_flags: <defaults>
</compile_context>

<pallas_src>
import jax
import jax.numpy as jnp
import numpy as np
from jax.experimental import pallas as pl
from jax.experimental.pallas import tpu as pltpu

_CP = 32  # conv channel width (27 input channels zero-padded to 32)

# ---------------------------------------------------------------------------
# Packed layout for the tiny MLP parameters: one (R, 32) f32 blob, one DMA.
# ---------------------------------------------------------------------------
_SMALL_SHAPES = (
    ('gw1', (2, 16)), ('gb1', (1, 16)),      # global_net Linear(2,16)
    ('gw2', (16, 8)), ('gb2', (1, 8)),       # global_net Linear(16,8)
    ('vw1g', (8, 32)), ('vb1', (1, 32)),     # value_head L1 (global part+bias)
    ('vw2', (32, 16)), ('vb2', (1, 16)),     # value_head L2
    ('vw3', (16, 1)), ('vb3', (1, 1)),       # value_head L3
)


def _build_layout():
    layout, off = {}, 0
    for name, (r, c) in _SMALL_SHAPES:
        layout[name] = (off, r, c)
        off += -(-r // 8) * 8                # 8-row aligned blocks
    return layout, off


_LAYOUT, _BLOB_ROWS = _build_layout()
_BLOB_COLS = 32


# ---------------------------------------------------------------------------
# Fused Critic kernel.
# ---------------------------------------------------------------------------
def _critic_kernel(sp_ref, g_ref, wc1_ref, wc2_ref, cbias_ref, vw1s_ref,
                   small_ref, o_ref, xp_ref):
    bt, Hp, WLp = sp_ref.shape               # Hp = H+2, WLp = (W+2)*32
    H = Hp - 2
    WL = WLp - 2 * _CP                       # W*32 (lane-dense conv output)
    rows = bt * H

    def p(name):                             # slice a tiny param from the ref
        off, r, c = _LAYOUT[name]
        return small_ref[off:off + r, :c]

    def conv3x3(src_ref, w_ref, cb):
        # 3x3 conv as 3 accumulating matmuls (one per kernel row dh) against
        # W-banded weights; bf16 operands, f32 accumulation. All operands are
        # full-lane-width slabs -- no im2col scratch, no masked stores.
        acc = jnp.dot(src_ref[:, 0:H, :].reshape(rows, WLp), w_ref[0],
                      preferred_element_type=jnp.float32)
        for dh in (1, 2):
            acc = acc + jnp.dot(src_ref[:, dh:dh + H, :].reshape(rows, WLp),
                                w_ref[dh], preferred_element_type=jnp.float32)
        return jnp.maximum(acc + cb, 0.0)    # (rows, W*32) f32, bias+ReLU

    # -- conv1 + ReLU: reads the pre-padded bf16 input block directly --------
    h1 = conv3x3(sp_ref, wc1_ref, cbias_ref[0:1, :])

    # -- stage conv1 output + zero halo into the bf16 scratch for conv2 ------
    # Every row of xp is rewritten each step -> no cross-step state, safe
    # under a "parallel" (multi-core) batch grid axis.
    zc = jnp.zeros((bt, H, _CP), jnp.bfloat16)
    xp_ref[:, 1:H + 1, :] = jnp.concatenate(
        [zc, h1.astype(jnp.bfloat16).reshape(bt, H, WL), zc], axis=-1)
    zr = jnp.zeros((bt, 1, WLp), jnp.bfloat16)
    xp_ref[:, 0:1, :] = zr
    xp_ref[:, H + 1:H + 2, :] = zr

    # -- conv2 + ReLU ---------------------------------------------------------
    h2 = conv3x3(xp_ref, wc2_ref, cbias_ref[1:2, :])

    # NHWC flatten: (bt*H, W*32) -> (bt, H*W*32). vw1s rows were permuted once
    # at pack time from torch's NCHW flatten order to this order.
    sf = h2.astype(jnp.bfloat16).reshape(bt, H * WL)

    # -- global_net: Linear(2,16)+ReLU as VPU broadcast-FMA, Linear(16,8)+ReLU
    g = g_ref[...].reshape(bt, 2)
    gw1 = p('gw1')
    hg = jnp.maximum(
        g[:, 0:1] * gw1[0:1, :] + g[:, 1:2] * gw1[1:2, :] + p('gb1'), 0.0)
    gout = jnp.maximum(
        jnp.dot(hg, p('gw2'), preferred_element_type=jnp.float32) + p('gb2'),
        0.0)

    # -- value_head: concat([sf, gout], 1) @ W1 == sf @ W1s + gout @ W1g ------
    v = (jnp.dot(sf, vw1s_ref[...], preferred_element_type=jnp.float32)
         + jnp.dot(gout, p('vw1g'), preferred_element_type=jnp.float32)
         + p('vb1'))
    v = jnp.maximum(v, 0.0)
    v = jnp.maximum(
        jnp.dot(v, p('vw2'), preferred_element_type=jnp.float32) + p('vb2'),
        0.0)
    out = jnp.dot(v, p('vw3'), preferred_element_type=jnp.float32) + p('vb3')
    o_ref[...] = out.reshape(bt, 1, 1)


def critic_forward(params, spatial, global_features, *, batch_tile=None):
    """Fused Critic forward. spatial: (B, H, W, 27) NHWC, global: (B, 2)."""
    B, H, W, Cin = spatial.shape
    WLp = (W + 2) * _CP
    # Default: one program (right for v5e/v6e). On v7x pass batch_tile=B//2
    # (any divisor of B) so the parallel grid axis uses both TensorCores.
    bt = B if batch_tile is None else batch_tile
    assert B % bt == 0
    grid = (B // bt,)

    # Pre-pad channels 27->32 + spatial halo, flatten (W+2, 32) into a
    # lane-dense 320-wide last dim, cast to bf16 (the MXU operand dtype).
    xpp = jnp.pad(spatial, ((0, 0), (1, 1), (1, 1), (0, _CP - Cin)))
    xpp = xpp.reshape(B, H + 2, WLp).astype(jnp.bfloat16)
    g3 = global_features.reshape(B, 1, 2).astype(jnp.float32)

    wc1, wc2 = params['wc1'], params['wc2']
    cbias, vw1s, small = params['cbias'], params['vw1s'], params['small']

    out = pl.pallas_call(
        _critic_kernel,
        out_shape=jax.ShapeDtypeStruct((B, 1, 1), jnp.float32),
        grid_spec=pltpu.PrefetchScalarGridSpec(
            num_scalar_prefetch=0,
            grid=grid,
            in_specs=[
                pl.BlockSpec((bt, H + 2, WLp), lambda i: (i, 0, 0)),
                pl.BlockSpec((bt, 1, 2), lambda i: (i, 0, 0)),
                pl.BlockSpec(wc1.shape, lambda i: (0, 0, 0)),
                pl.BlockSpec(wc2.shape, lambda i: (0, 0, 0)),
                pl.BlockSpec(cbias.shape, lambda i: (0, 0)),
                pl.BlockSpec(vw1s.shape, lambda i: (0, 0)),
                pl.BlockSpec(small.shape, lambda i: (0, 0)),
            ],
            out_specs=pl.BlockSpec((bt, 1, 1), lambda i: (i, 0, 0)),
            scratch_shapes=[
                pltpu.VMEM((bt, H + 2, WLp), jnp.bfloat16),  # conv2 staging
            ],
        ),
        compiler_params=pltpu.CompilerParams(
            dimension_semantics=("parallel",)),
    )(xpp, g3, wc1, wc2, cbias, vw1s, small)
    return out.reshape(B, 1)


# ---------------------------------------------------------------------------
# Parameters: torch-default random init + one-time conversion into the fused
# kernel's layout (exactly what a checkpoint converter would do).
# ---------------------------------------------------------------------------
def init_params(key, board_size):
    """PyTorch-default init: uniform(-1/sqrt(fan_in), +1/sqrt(fan_in))."""
    def u(k, shape, fan_in):
        b = 1.0 / (fan_in ** 0.5)
        return jax.random.uniform(k, shape, jnp.float32, -b, b)

    ks = jax.random.split(key, 15)
    sfs = 32 * board_size * board_size
    comb = sfs + 8
    return {
        'cw1': u(ks[0], (3, 3, 27, 32), 27 * 9),
        'cb1': u(ks[1], (1, 32), 27 * 9),
        'cw2': u(ks[2], (3, 3, 32, 32), 32 * 9),
        'cb2': u(ks[3], (1, 32), 32 * 9),
        'gw1': u(ks[4], (2, 16), 2),
        'gb1': u(ks[5], (1, 16), 2),
        'gw2': u(ks[6], (16, 8), 16),
        'gb2': u(ks[7], (1, 8), 16),
        'vw1s_nchw': u(ks[8], (sfs, 32), comb),
        'vw1g': u(ks[9], (8, 32), comb),
        'vb1': u(ks[10], (1, 32), comb),
        'vw2': u(ks[11], (32, 16), 32),
        'vb2': u(ks[12], (1, 16), 32),
        'vw3': u(ks[13], (16, 1), 16),
        'vb3': u(ks[14], (1, 1), 16),
    }


def _band_weights(cw_hwio, W):
    """(3, 3, Cin, Cout) conv kernel -> (3, (W+2)*Cin, W*Cout) W-banded
    matmul weights (one band matrix per kernel row dh)."""
    cw = np.asarray(jax.device_get(cw_hwio)).astype(np.float32)
    _, _, Ci, Co = cw.shape
    wb = np.zeros((3, (W + 2) * Ci, W * Co), np.float32)
    for dh in range(3):
        for w in range(W):
            for dw in range(3):
                wb[dh, (w + dw) * Ci:(w + dw + 1) * Ci,
                   w * Co:(w + 1) * Co] = cw[dh, dw]
    return jnp.asarray(wb, dtype=jnp.bfloat16)


def pack_params(raw, board_size):
    """One-time layout conversion for the fused kernel."""
    H = W = board_size
    # conv1: zero-pad cin 27->32 so all lane math is 32-aligned.
    cw1 = jnp.pad(raw['cw1'],
                  ((0, 0), (0, 0), (0, _CP - raw['cw1'].shape[2]), (0, 0)))
    wc1 = _band_weights(cw1, W)
    wc2 = _band_weights(raw['cw2'], W)
    # conv biases pre-tiled along the (w, cout) lane axis.
    cbias = jnp.concatenate([jnp.tile(raw['cb1'], (1, W)),
                             jnp.tile(raw['cb2'], (1, W))], axis=0)
    # vw1s: permute rows once from NCHW flatten order (torch) to NHWC flatten
    # order so the kernel needs no transpose of the conv features.
    c = jnp.arange(_CP)
    h = jnp.arange(H)
    w = jnp.arange(W)
    nchw_idx = (c[None, None, :] * H * W + h[:, None, None] * W
                + w[None, :, None]).reshape(-1)
    vw1s = raw['vw1s_nchw'][nchw_idx, :].astype(jnp.bfloat16)
    # pack all tiny MLP params into one f32 blob (single DMA).
    blob = jnp.zeros((_BLOB_ROWS, _BLOB_COLS), jnp.float32)
    for name, _ in _SMALL_SHAPES:
        off, r, cc = _LAYOUT[name]
        blob = blob.at[off:off + r, :cc].set(raw[name])
    return {'wc1': wc1, 'wc2': wc2, 'cbias': cbias, 'vw1s': vw1s,
            'small': blob}


def reference_forward(raw, spatial, global_features):
    """Pure-JAX f32 reference using the transpose-based NCHW flatten path."""
    y = jax.lax.conv_general_dilated(
        spatial, raw['cw1'], (1, 1), 'SAME',
        dimension_numbers=('NHWC', 'HWIO', 'NHWC'))
    y = jnp.maximum(y + raw['cb1'].reshape(1, 1, 1, -1), 0.0)
    y = jax.lax.conv_general_dilated(
        y, raw['cw2'], (1, 1), 'SAME',
        dimension_numbers=('NHWC', 'HWIO', 'NHWC'))
    y = jnp.maximum(y + raw['cb2'].reshape(1, 1, 1, -1), 0.0)
    sf = jnp.transpose(y, (0, 3, 1, 2)).reshape(spatial.shape[0], -1)
    hg = jnp.maximum(global_features @ raw['gw1'] + raw['gb1'], 0.0)
    g = jnp.maximum(hg @ raw['gw2'] + raw['gb2'], 0.0)
    v = jnp.maximum(sf @ raw['vw1s_nchw'] + g @ raw['vw1g'] + raw['vb1'], 0.0)
    v = jnp.maximum(v @ raw['vw2'] + raw['vb2'], 0.0)
    return v @ raw['vw3'] + raw['vb3']


if __name__ == "__main__":
    board_size = 8
    B = 2
    key = jax.random.PRNGKey(0)
    pkey, skey, gkey = jax.random.split(key, 3)

    raw = init_params(pkey, board_size)
    params = pack_params(raw, board_size)

    spatial = jax.random.normal(skey, (B, board_size, board_size, 27),
                                jnp.float32)
    gfeat = jax.random.normal(gkey, (B, 2), jnp.float32)

    out = jax.block_until_ready(jax.jit(critic_forward)(params, spatial, gfeat))
    assert out.shape == (B, 1) and out.dtype == jnp.float32

    # Parity check vs. the pure-JAX f32 path (bf16 MXU tolerance).
    ref = reference_forward(raw, spatial, gfeat)
    assert jnp.allclose(out, ref, rtol=5e-2, atol=5e-2), (out, ref)
    print("KERNEL_OK")
</pallas_src>

<mosaic_0001>
module attributes {stable_mosaic.version = 11 : i64} {
  func.func @_critic_kernel(%arg0: i32, %arg1: memref<2x10x320xbf16, #tpu.memory_space<vmem>>, %arg2: memref<2x1x2xf32, #tpu.memory_space<vmem>>, %arg3: memref<3x320x256xbf16, #tpu.memory_space<vmem>>, %arg4: memref<3x320x256xbf16, #tpu.memory_space<vmem>>, %arg5: memref<2x256xf32, #tpu.memory_space<vmem>>, %arg6: memref<2048x32xbf16, #tpu.memory_space<vmem>>, %arg7: memref<120x32xf32, #tpu.memory_space<vmem>>, %arg8: memref<2x1x1xf32, #tpu.memory_space<vmem>>, %arg9: memref<2x10x320xbf16, #tpu.memory_space<vmem>>) attributes {dimension_semantics = [#tpu.dimension_semantics<parallel>], iteration_bounds = array<i64: 1>, scalar_prefetch = 0 : i64, scratch_operands = 1 : i64, tpu.core_type = #tpu.core_type<tc>, window_params = [{transform_indices = @transform_0, window_bounds = array<i64: 2, 10, 320>}, {transform_indices = @transform_1, window_bounds = array<i64: 2, 1, 2>}, {pipeline_mode = #tpu.pipeline_mode<synchronous>, transform_indices = @transform_2, window_bounds = array<i64: 3, 320, 256>}, {pipeline_mode = #tpu.pipeline_mode<synchronous>, transform_indices = @transform_3, window_bounds = array<i64: 3, 320, 256>}, {pipeline_mode = #tpu.pipeline_mode<synchronous>, transform_indices = @transform_4, window_bounds = array<i64: 2, 256>}, {pipeline_mode = #tpu.pipeline_mode<synchronous>, transform_indices = @transform_5, window_bounds = array<i64: 2048, 32>}, {pipeline_mode = #tpu.pipeline_mode<synchronous>, transform_indices = @transform_6, window_bounds = array<i64: 120, 32>}, {transform_indices = @transform_7, window_bounds = array<i64: 2, 1, 1>}]} {
    %c0 = arith.constant 0 : index
    %c0_0 = arith.constant 0 : index
    %0 = vector.load %arg5[%c0, %c0_0] : memref<2x256xf32, #tpu.memory_space<vmem>>, vector<1x256xf32>
    %c0_1 = arith.constant 0 : index
    %c0_2 = arith.constant 0 : index
    %c0_3 = arith.constant 0 : index
    %1 = vector.load %arg1[%c0_1, %c0_2, %c0_3] : memref<2x10x320xbf16, #tpu.memory_space<vmem>>, vector<2x8x320xbf16>
    %2 = vector.shape_cast %1 : vector<2x8x320xbf16> to vector<16x320xbf16>
    %c0_4 = arith.constant 0 : index
    %c0_5 = arith.constant 0 : index
    %c0_6 = arith.constant 0 : index
    %3 = vector.load %arg3[%c0_4, %c0_5, %c0_6] : memref<3x320x256xbf16, #tpu.memory_space<vmem>>, vector<1x320x256xbf16>
    %4 = vector.shape_cast %3 : vector<1x320x256xbf16> to vector<320x256xbf16>
    %cst = arith.constant dense<0.000000e+00> : vector<16x256xf32>
    %5 = tpu.matmul %2, %4, %cst {dimension_numbers = #tpu.dot_dimension_numbers<[1], [0], [0], [1], [0, 0, 1, 1], [], []>} : vector<16x320xbf16>, vector<320x256xbf16>, vector<16x256xf32> -> vector<16x256xf32>
    %c0_7 = arith.constant 0 : index
    %c1 = arith.constant 1 : index
    %c0_8 = arith.constant 0 : index
    %6 = vector.load %arg1[%c0_7, %c1, %c0_8] : memref<2x10x320xbf16, #tpu.memory_space<vmem>>, vector<2x8x320xbf16>
    %7 = vector.shape_cast %6 : vector<2x8x320xbf16> to vector<16x320xbf16>
    %c1_9 = arith.constant 1 : index
    %c0_10 = arith.constant 0 : index
    %c0_11 = arith.constant 0 : index
    %8 = vector.load %arg3[%c1_9, %c0_10, %c0_11] : memref<3x320x256xbf16, #tpu.memory_space<vmem>>, vector<1x320x256xbf16>
    %9 = vector.shape_cast %8 : vector<1x320x256xbf16> to vector<320x256xbf16>
    %cst_12 = arith.constant dense<0.000000e+00> : vector<16x256xf32>
    %10 = tpu.matmul %7, %9, %cst_12 {dimension_numbers = #tpu.dot_dimension_numbers<[1], [0], [0], [1], [0, 0, 1, 1], [], []>} : vector<16x320xbf16>, vector<320x256xbf16>, vector<16x256xf32> -> vector<16x256xf32>
    %11 = arith.addf %5, %10 : vector<16x256xf32>
    %c0_13 = arith.constant 0 : index
    %c2 = arith.constant 2 : index
    %c0_14 = arith.constant 0 : index
    %12 = vector.load %arg1[%c0_13, %c2, %c0_14] : memref<2x10x320xbf16, #tpu.memory_space<vmem>>, vector<2x8x320xbf16>
    %13 = vector.shape_cast %12 : vector<2x8x320xbf16> to vector<16x320xbf16>
    %c2_15 = arith.constant 2 : index
    %c0_16 = arith.constant 0 : index
    %c0_17 = arith.constant 0 : index
    %14 = vector.load %arg3[%c2_15, %c0_16, %c0_17] : memref<3x320x256xbf16, #tpu.memory_space<vmem>>, vector<1x320x256xbf16>
    %15 = vector.shape_cast %14 : vector<1x320x256xbf16> to vector<320x256xbf16>
    %cst_18 = arith.constant dense<0.000000e+00> : vector<16x256xf32>
    %16 = tpu.matmul %13, %15, %cst_18 {dimension_numbers = #tpu.dot_dimension_numbers<[1], [0], [0], [1], [0, 0, 1, 1], [], []>} : vector<16x320xbf16>, vector<320x256xbf16>, vector<16x256xf32> -> vector<16x256xf32>
    %17 = arith.addf %11, %16 : vector<16x256xf32>
    %18 = vector.broadcast %0 : vector<1x256xf32> to vector<16x256xf32>
    %19 = arith.addf %17, %18 : vector<16x256xf32>
    %cst_19 = arith.constant 0.000000e+00 : f32
    %20 = vector.broadcast %cst_19 : f32 to vector<16x256xf32>
    %21 = arith.maximumf %19, %20 : vector<16x256xf32>
    %cst_20 = arith.constant 0.000000e+00 : bf16
    %22 = vector.broadcast %cst_20 : bf16 to vector<2x8x32xbf16>
    %23 = arith.truncf %21 : vector<16x256xf32> to vector<16x256xbf16>
    %24 = vector.shape_cast %23 : vector<16x256xbf16> to vector<2x8x256xbf16>
    %25 = tpu.concatenate %22, %24, %22 in 2 : vector<2x8x32xbf16>, vector<2x8x256xbf16>, vector<2x8x32xbf16> -> vector<2x8x320xbf16>
    %c0_21 = arith.constant 0 : index
    %c1_22 = arith.constant 1 : index
    %c0_23 = arith.constant 0 : index
    %26 = vector.load %arg9[%c0_21, %c1_22, %c0_23] : memref<2x10x320xbf16, #tpu.memory_space<vmem>>, vector<2x8x320xbf16>
    tpu.vector_store %arg9[%c0_21, %c1_22, %c0_23], %25 {strides = array<i32>} : memref<2x10x320xbf16, #tpu.memory_space<vmem>>, vector<2x8x320xbf16>,
    %cst_24 = arith.constant 0.000000e+00 : bf16
    %27 = vector.broadcast %cst_24 : bf16 to vector<2x1x320xbf16>
    %c0_25 = arith.constant 0 : index
    %c0_26 = arith.constant 0 : index
    %c0_27 = arith.constant 0 : index
    %28 = vector.load %arg9[%c0_25, %c0_26, %c0_27] : memref<2x10x320xbf16, #tpu.memory_space<vmem>>, vector<2x1x320xbf16>
    tpu.vector_store %arg9[%c0_25, %c0_26, %c0_27], %27 {strides = array<i32>} : memref<2x10x320xbf16, #tpu.memory_space<vmem>>, vector<2x1x320xbf16>,
    %c0_28 = arith.constant 0 : index
    %c9 = arith.constant 9 : index
    %c0_29 = arith.constant 0 : index
    %29 = vector.load %arg9[%c0_28, %c9, %c0_29] : memref<2x10x320xbf16, #tpu.memory_space<vmem>>, vector<2x1x320xbf16>
    tpu.vector_store %arg9[%c0_28, %c9, %c0_29], %27 {strides = array<i32>} : memref<2x10x320xbf16, #tpu.memory_space<vmem>>, vector<2x1x320xbf16>,
    %c1_30 = arith.constant 1 : index
    %c0_31 = arith.constant 0 : index
    %30 = vector.load %arg5[%c1_30, %c0_31] : memref<2x256xf32, #tpu.memory_space<vmem>>, vector<1x256xf32>
    %c0_32 = arith.constant 0 : index
    %c0_33 = arith.constant 0 : index
    %c0_34 = arith.constant 0 : index
    %31 = vector.load %arg9[%c0_32, %c0_33, %c0_34] : memref<2x10x320xbf16, #tpu.memory_space<vmem>>, vector<2x8x320xbf16>
    %32 = vector.shape_cast %31 : vector<2x8x320xbf16> to vector<16x320xbf16>
    %c0_35 = arith.constant 0 : index
    %c0_36 = arith.constant 0 : index
    %c0_37 = arith.constant 0 : index
    %33 = vector.load %arg4[%c0_35, %c0_36, %c0_37] : memref<3x320x256xbf16, #tpu.memory_space<vmem>>, vector<1x320x256xbf16>
    %34 = vector.shape_cast %33 : vector<1x320x256xbf16> to vector<320x256xbf16>
    %cst_38 = arith.constant dense<0.000000e+00> : vector<16x256xf32>
    %35 = tpu.matmul %32, %34, %cst_38 {dimension_numbers = #tpu.dot_dimension_numbers<[1], [0], [0], [1], [0, 0, 1, 1], [], []>} : vector<16x320xbf16>, vector<320x256xbf16>, vector<16x256xf32> -> vector<16x256xf32>
    %c0_39 = arith.constant 0 : index
    %c1_40 = arith.constant 1 : index
    %c0_41 = arith.constant 0 : index
    %36 = vector.load %arg9[%c0_39, %c1_40, %c0_41] : memref<2x10x320xbf16, #tpu.memory_space<vmem>>, vector<2x8x320xbf16>
    %37 = vector.shape_cast %36 : vector<2x8x320xbf16> to vector<16x320xbf16>
    %c1_42 = arith.constant 1 : index
    %c0_43 = arith.constant 0 : index
    %c0_44 = arith.constant 0 : index
    %38 = vector.load %arg4[%c1_42, %c0_43, %c0_44] : memref<3x320x256xbf16, #tpu.memory_space<vmem>>, vector<1x320x256xbf16>
    %39 = vector.shape_cast %38 : vector<1x320x256xbf16> to vector<320x256xbf16>
    %cst_45 = arith.constant dense<0.000000e+00> : vector<16x256xf32>
    %40 = tpu.matmul %37, %39, %cst_45 {dimension_numbers = #tpu.dot_dimension_numbers<[1], [0], [0], [1], [0, 0, 1, 1], [], []>} : vector<16x320xbf16>, vector<320x256xbf16>, vector<16x256xf32> -> vector<16x256xf32>
    %41 = arith.addf %35, %40 : vector<16x256xf32>
    %c0_46 = arith.constant 0 : index
    %c2_47 = arith.constant 2 : index
    %c0_48 = arith.constant 0 : index
    %42 = vector.load %arg9[%c0_46, %c2_47, %c0_48] : memref<2x10x320xbf16, #tpu.memory_space<vmem>>, vector<2x8x320xbf16>
    %43 = vector.shape_cast %42 : vector<2x8x320xbf16> to vector<16x320xbf16>
    %c2_49 = arith.constant 2 : index
    %c0_50 = arith.constant 0 : index
    %c0_51 = arith.constant 0 : index
    %44 = vector.load %arg4[%c2_49, %c0_50, %c0_51] : memref<3x320x256xbf16, #tpu.memory_space<vmem>>, vector<1x320x256xbf16>
    %45 = vector.shape_cast %44 : vector<1x320x256xbf16> to vector<320x256xbf16>
    %cst_52 = arith.constant dense<0.000000e+00> : vector<16x256xf32>
    %46 = tpu.matmul %43, %45, %cst_52 {dimension_numbers = #tpu.dot_dimension_numbers<[1], [0], [0], [1], [0, 0, 1, 1], [], []>} : vector<16x320xbf16>, vector<320x256xbf16>, vector<16x256xf32> -> vector<16x256xf32>
    %47 = arith.addf %41, %46 : vector<16x256xf32>
    %48 = vector.broadcast %30 : vector<1x256xf32> to vector<16x256xf32>
    %49 = arith.addf %47, %48 : vector<16x256xf32>
    %cst_53 = arith.constant 0.000000e+00 : f32
    %50 = vector.broadcast %cst_53 : f32 to vector<16x256xf32>
    %51 = arith.maximumf %49, %50 : vector<16x256xf32>
    %52 = arith.truncf %51 : vector<16x256xf32> to vector<16x256xbf16>
    %53 = vector.shape_cast %52 : vector<16x256xbf16> to vector<2x2048xbf16>
    %c0_54 = arith.constant 0 : index
    %c0_55 = arith.constant 0 : index
    %c0_56 = arith.constant 0 : index
    %54 = vector.load %arg2[%c0_54, %c0_55, %c0_56] : memref<2x1x2xf32, #tpu.memory_space<vmem>>, vector<2x1x2xf32>
    %55 = vector.shape_cast %54 : vector<2x1x2xf32> to vector<2x2xf32>
    %c0_57 = arith.constant 0 : index
    %c0_58 = arith.constant 0 : index
    %56 = vector.load %arg7[%c0_57, %c0_58] : memref<120x32xf32, #tpu.memory_space<vmem>>, vector<2x16xf32>
    %57 = vector.extract_strided_slice %55 {offsets = [0, 0], sizes = [2, 1], strides = [1, 1]} : vector<2x2xf32> to vector<2x1xf32>
    %58 = vector.extract_strided_slice %56 {offsets = [0, 0], sizes = [1, 16], strides = [1, 1]} : vector<2x16xf32> to vector<1x16xf32>
    %59 = vector.broadcast %57 : vector<2x1xf32> to vector<2x16xf32>
    %60 = vector.broadcast %58 : vector<1x16xf32> to vector<2x16xf32>
    %61 = arith.mulf %59, %60 : vector<2x16xf32>
    %62 = vector.extract_strided_slice %55 {offsets = [0, 1], sizes = [2, 1], strides = [1, 1]} : vector<2x2xf32> to vector<2x1xf32>
    %63 = vector.extract_strided_slice %56 {offsets = [1, 0], sizes = [1, 16], strides = [1, 1]} : vector<2x16xf32> to vector<1x16xf32>
    %64 = vector.broadcast %62 : vector<2x1xf32> to vector<2x16xf32>
    %65 = vector.broadcast %63 : vector<1x16xf32> to vector<2x16xf32>
    %66 = arith.mulf %64, %65 : vector<2x16xf32>
    %67 = arith.addf %61, %66 : vector<2x16xf32>
    %c8 = arith.constant 8 : index
    %c0_59 = arith.constant 0 : index
    %68 = vector.load %arg7[%c8, %c0_59] : memref<120x32xf32, #tpu.memory_space<vmem>>, vector<1x16xf32>
    %69 = vector.broadcast %68 : vector<1x16xf32> to vector<2x16xf32>
    %70 = arith.addf %67, %69 : vector<2x16xf32>
    %cst_60 = arith.constant 0.000000e+00 : f32
    %71 = vector.broadcast %cst_60 : f32 to vector<2x16xf32>
    %72 = arith.maximumf %70, %71 : vector<2x16xf32>
    %c16 = arith.constant 16 : index
    %c0_61 = arith.constant 0 : index
    %73 = vector.load %arg7[%c16, %c0_61] : memref<120x32xf32, #tpu.memory_space<vmem>>, vector<16x8xf32>
    %cst_62 = arith.constant dense<0.000000e+00> : vector<2x8xf32>
    %74 = tpu.matmul %72, %73, %cst_62 {dimension_numbers = #tpu.dot_dimension_numbers<[1], [0], [0], [1], [0, 0, 1, 1], [], []>} : vector<2x16xf32>, vector<16x8xf32>, vector<2x8xf32> -> vector<2x8xf32>
    %c32 = arith.constant 32 : index
    %c0_63 = arith.constant 0 : index
    %75 = vector.load %arg7[%c32, %c0_63] : memref<120x32xf32, #tpu.memory_space<vmem>>, vector<1x8xf32>
    %76 = vector.broadcast %75 : vector<1x8xf32> to vector<2x8xf32>
    %77 = arith.addf %74, %76 : vector<2x8xf32>
    %cst_64 = arith.constant 0.000000e+00 : f32
    %78 = vector.broadcast %cst_64 : f32 to vector<2x8xf32>
    %79 = arith.maximumf %77, %78 : vector<2x8xf32>
    %c0_65 = arith.constant 0 : index
    %c0_66 = arith.constant 0 : index
    %80 = vector.load %arg6[%c0_65, %c0_66] : memref<2048x32xbf16, #tpu.memory_space<vmem>>, vector<2048x32xbf16>
    %cst_67 = arith.constant dense<0.000000e+00> : vector<2x32xf32>
    %81 = tpu.matmul %53, %80, %cst_67 {dimension_numbers = #tpu.dot_dimension_numbers<[1], [0], [0], [1], [0, 0, 1, 1], [], []>} : vector<2x2048xbf16>, vector<2048x32xbf16>, vector<2x32xf32> -> vector<2x32xf32>
    %c40 = arith.constant 40 : index
    %c0_68 = arith.constant 0 : index
    %82 = vector.load %arg7[%c40, %c0_68] : memref<120x32xf32, #tpu.memory_space<vmem>>, vector<8x32xf32>
    %cst_69 = arith.constant dense<0.000000e+00> : vector<2x32xf32>
    %83 = tpu.matmul %79, %82, %cst_69 {dimension_numbers = #tpu.dot_dimension_numbers<[1], [0], [0], [1], [0, 0, 1, 1], [], []>} : vector<2x8xf32>, vector<8x32xf32>, vector<2x32xf32> -> vector<2x32xf32>
    %84 = arith.addf %81, %83 : vector<2x32xf32>
    %c48 = arith.constant 48 : index
    %c0_70 = arith.constant 0 : index
    %85 = vector.load %arg7[%c48, %c0_70] : memref<120x32xf32, #tpu.memory_space<vmem>>, vector<1x32xf32>
    %86 = vector.broadcast %85 : vector<1x32xf32> to vector<2x32xf32>
    %87 = arith.addf %84, %86 : vector<2x32xf32>
    %cst_71 = arith.constant 0.000000e+00 : f32
    %88 = vector.broadcast %cst_71 : f32 to vector<2x32xf32>
    %89 = arith.maximumf %87, %88 : vector<2x32xf32>
    %c56 = arith.constant 56 : index
    %c0_72 = arith.constant 0 : index
    %90 = vector.load %arg7[%c56, %c0_72] : memref<120x32xf32, #tpu.memory_space<vmem>>, vector<32x16xf32>
    %cst_73 = arith.constant dense<0.000000e+00> : vector<2x16xf32>
    %91 = tpu.matmul %89, %90, %cst_73 {dimension_numbers = #tpu.dot_dimension_numbers<[1], [0], [0], [1], [0, 0, 1, 1], [], []>} : vector<2x32xf32>, vector<32x16xf32>, vector<2x16xf32> -> vector<2x16xf32>
    %c88 = arith.constant 88 : index
    %c0_74 = arith.constant 0 : index
    %92 = vector.load %arg7[%c88, %c0_74] : memref<120x32xf32, #tpu.memory_space<vmem>>, vector<1x16xf32>
    %93 = vector.broadcast %92 : vector<1x16xf32> to vector<2x16xf32>
    %94 = arith.addf %91, %93 : vector<2x16xf32>
    %cst_75 = arith.constant 0.000000e+00 : f32
    %95 = vector.broadcast %cst_75 : f32 to vector<2x16xf32>
    %96 = arith.maximumf %94, %95 : vector<2x16xf32>
    %c96 = arith.constant 96 : index
    %c0_76 = arith.constant 0 : index
    %97 = vector.load %arg7[%c96, %c0_76] : memref<120x32xf32, #tpu.memory_space<vmem>>, vector<16x1xf32>
    %cst_77 = arith.constant dense<0.000000e+00> : vector<2x1xf32>
    %98 = tpu.matmul %96, %97, %cst_77 {dimension_numbers = #tpu.dot_dimension_numbers<[1], [0], [0], [1], [0, 0, 1, 1], [], []>} : vector<2x16xf32>, vector<16x1xf32>, vector<2x1xf32> -> vector<2x1xf32>
    %c112 = arith.constant 112 : index
    %c0_78 = arith.constant 0 : index
    %99 = vector.load %arg7[%c112, %c0_78] : memref<120x32xf32, #tpu.memory_space<vmem>>, vector<1x1xf32>
    %100 = vector.broadcast %99 : vector<1x1xf32> to vector<2x1xf32>
    %101 = arith.addf %98, %100 : vector<2x1xf32>
    %102 = vector.shape_cast %101 : vector<2x1xf32> to vector<2x1x1xf32>
    %c0_79 = arith.constant 0 : index
    %c0_80 = arith.constant 0 : index
    %c0_81 = arith.constant 0 : index
    %103 = vector.load %arg8[%c0_79, %c0_80, %c0_81] : memref<2x1x1xf32, #tpu.memory_space<vmem>>, vector<2x1x1xf32>
    tpu.vector_store %arg8[%c0_79, %c0_80, %c0_81], %102 {strides = array<i32>} : memref<2x1x1xf32, #tpu.memory_space<vmem>>, vector<2x1x1xf32>,
    return
  }
  func.func @transform_0(%arg0: i32) -> (i32, i32, i32) {
    %c0_i32 = arith.constant 0 : i32
    %c0_i32_0 = arith.constant 0 : i32
    %c0_i32_1 = arith.constant 0 : i32
    return %arg0, %c0_i32, %c0_i32_0 : i32, i32, i32
  }
  func.func @transform_1(%arg0: i32) -> (i32, i32, i32) {
    %c0_i32 = arith.constant 0 : i32
    %c0_i32_0 = arith.constant 0 : i32
    %c0_i32_1 = arith.constant 0 : i32
    return %arg0, %c0_i32, %c0_i32_0 : i32, i32, i32
  }
  func.func @transform_2(%arg0: i32) -> (i32, i32, i32) {
    %c0_i32 = arith.constant 0 : i32
    %c0_i32_0 = arith.constant 0 : i32
    %c0_i32_1 = arith.constant 0 : i32
    %c0_i32_2 = arith.constant 0 : i32
    return %c0_i32, %c0_i32_0, %c0_i32_1 : i32, i32, i32
  }
  func.func @transform_3(%arg0: i32) -> (i32, i32, i32) {
    %c0_i32 = arith.constant 0 : i32
    %c0_i32_0 = arith.constant 0 : i32
    %c0_i32_1 = arith.constant 0 : i32
    %c0_i32_2 = arith.constant 0 : i32
    return %c0_i32, %c0_i32_0, %c0_i32_1 : i32, i32, i32
  }
  func.func @transform_4(%arg0: i32) -> (i32, i32) {
    %c0_i32 = arith.constant 0 : i32
    %c0_i32_0 = arith.constant 0 : i32
    %c0_i32_1 = arith.constant 0 : i32
    return %c0_i32, %c0_i32_0 : i32, i32
  }
  func.func @transform_5(%arg0: i32) -> (i32, i32) {
    %c0_i32 = arith.constant 0 : i32
    %c0_i32_0 = arith.constant 0 : i32
    %c0_i32_1 = arith.constant 0 : i32
    return %c0_i32, %c0_i32_0 : i32, i32
  }
  func.func @transform_6(%arg0: i32) -> (i32, i32) {
    %c0_i32 = arith.constant 0 : i32
    %c0_i32_0 = arith.constant 0 : i32
    %c0_i32_1 = arith.constant 0 : i32
    return %c0_i32, %c0_i32_0 : i32, i32
  }
  func.func @transform_7(%arg0: i32) -> (i32, i32, i32) {
    %c0_i32 = arith.constant 0 : i32
    %c0_i32_0 = arith.constant 0 : i32
    %c0_i32_1 = arith.constant 0 : i32
    return %arg0, %c0_i32, %c0_i32_0 : i32, i32, i32
  }
}

</mosaic_0001>

<bundles_post_ra>
// kernel: critic_forward.1
= control target key start
LH: loop header
LB: loop body
LE: loop exit
PB: predicated region body
PF: predicated region fallthrough
CT: control target
= control target key end

     0   :  { %v5839_v1 = vmov 0   ;;  %vm76_vm0 = vsmask.f32 3328  ;;  %vm77_vm1 = vsmask.f32 7440  ;;  %vm7461_vm3 = vcmask 523264   ;;  %s7453_s2 = inlined_call_operand.vmem [shape: bf16[3,320,256], index: 2, kind: input, shape index: {}]   ;;  %s7454_s0 = inlined_call_operand.vmem [shape: bf16[2,10,320], index: 0, kind: input, shape index: {}]   ;;  %s7455_s3 = inlined_call_operand.vmem [shape: bf16[3,320,256], index: 3, kind: input, shape index: {}]   ;;  %s7456_s4 = inlined_call_operand.vmem [shape: f32[2,256], index: 4, kind: input, shape index: {}]   ;;  %s7457_s1 = inlined_call_operand.vmem [shape: f32[2,1,2], index: 1, kind: input, shape index: {}]   ;;  %s7458_s6 = inlined_call_operand.vmem [shape: f32[120,32], index: 6, kind: input, shape index: {}]   ;;  %s7459_s5 = inlined_call_operand.vmem [shape: bf16[2048,32], index: 5, kind: input, shape index: {}]   ;;  %s7460_s7 = inlined_call_operand.vmem [shape: f32[2,1,1], index: 7, kind: output, shape index: {}]  }
   0x1   :  { %v5345_v0 = vld [vmem:[%s7453_s2 + $0x144] ss:$8 sps:$4 sm:$0xff]   ;;  %5342 = vset.pattern.permute.xlu1 %v5839_v1  ;;  %5341 = vset.pattern.permute.xlu0 %v5839_v1  ;;  %v5347_v2 = vld [vmem:[%s7453_s2 + $0x140] ss:$8 sps:$4 sm:$0xff]   ;;  %v5348_v3 = vld [vmem:[%s7453_s2 + $0x154] ss:$8 sps:$4 sm:$0xff]  }
   0x2   :  { %391 = vmatprep.subr.bf16.mxu0 %v5345_v0  ;;  %v5350_v4 = vld [vmem:[%s7453_s2 + $0x150] ss:$8 sps:$4 sm:$0xff]   ;;  %v5351_v5 = vld [vmem:[%s7453_s2 + $0x164] ss:$8 sps:$4 sm:$0xff]   ;;  %v5353_v6 = vld [vmem:[%s7453_s2 + $0x160] ss:$8 sps:$4 sm:$0xff]  }
   0x3   :  { %392 = vmatpush1.bf16.msra.mxu0 %v5347_v2  ;;  %v5354_v7 = vld [vmem:[%s7453_s2 + $0x174] ss:$8 sps:$4 sm:$0xff]   ;;  %v5356_v8 = vld [vmem:[%s7453_s2 + $0x170] ss:$8 sps:$4 sm:$0xff]   ;;  %v5357_v9 = vld [vmem:[%s7453_s2 + $0x184] ss:$8 sps:$4 sm:$0xff]  }
   0x4   :  { %393 = vmatprep.subr.bf16.mxu0 %v5348_v3  ;;  %v5359_v10 = vld [vmem:[%s7453_s2 + $0x180] ss:$8 sps:$4 sm:$0xff]   ;;  %v5360_v11 = vld [vmem:[%s7453_s2 + $0x194] ss:$8 sps:$4 sm:$0xff]   ;;  %v5362_v12 = vld [vmem:[%s7453_s2 + $0x190] ss:$8 sps:$4 sm:$0xff]  }
   0x5   :  { %v5363_v13 = vld [vmem:[%s7453_s2 + $0x1a4] ss:$8 sps:$4 sm:$0xff]   ;;  %v5365_v14 = vld [vmem:[%s7453_s2 + $0x1a0] ss:$8 sps:$4 sm:$0xff]   ;;  %v5938_v16 = vld [vmem:[%s7454_s0 + $0x18] sm:$0xff]  ;;  %vm793_vm4 = vcmask 1042432  }
   0x6   :  { %v5933_v15 = vld [vmem:[%s7454_s0] sm:$0xff]  ;;  %v5943_v17 = vld [vmem:[%s7454_s0 + $0xc] sm:$0x11]  ;;  %v108_v23 = vshrl.u32 %v5938_v16, 16  ;;  %v111_v24 = vshll.u32 %v5938_v16, 16  ;;  %vm5965_vm2 = vmor %vm76_vm0, %vm77_vm1  ;;  %vm794_vm5 = vcmask 1046532  }
   0x7   :  { %394 = vmatpush1.bf16.msra.mxu0 %v5350_v4  ;;  %v5948_v18 = vld [vmem:[%s7454_s0 + $0x24] sm:$0x11]  ;;  %v80_v19 = vshrl.u32 %v5933_v15, 16  ;;  %v83_v20 = vshll.u32 %v5933_v15, 16  ;;  %v4556_v21 = vcombine.low %v5933_v15, %v5938_v16  ;;  %v89_v22 = vshll.u32 %v5943_v17, 16  ;;  %vm6116_vm6 = vmor %vm793_vm4, %vm794_vm5  ;;  %s5840_s21 = smov 32  }
   0x8   :  { %395 = vmatprep.subr.bf16.mxu0 %v5351_v5  ;;  %v117_v25 = vshll.u32 %v5948_v18, 16  ;;  %v5366_v26 = vld [vmem:[%s7453_s2 + $0x1b4] ss:$8 sps:$4 sm:$0xff]   ;;  %v110_v29 = vrot.slane %v108_v23, 4  ;;  %v113_v30 = vrot.slane %v111_v24, 5  ;;  %vm1263_vm7 = vcmask 1043456  }
   0x9   :  { %v82_v27 = vrot.slane %v80_v19, 4  ;;  %v85_v28 = vrot.slane %v83_v20, 5  ;;  %v5368_v31 = vld [vmem:[%s7453_s2 + $0x1b0] ss:$8 sps:$4 sm:$0xff]   ;;  %v91_v33 = vrot.slane %v89_v22, 5  ;;  %vm1196_vm9 = vcmask 261120  }
   0xa   :  { %v114_v35 = vor.u32 %v113_v30, %v110_v29  ;;  %v119_v36 = vrot.slane %v117_v25, 5  ;;  %v5369_v37 = vld [vmem:[%s7453_s2 + $0x1c4] ss:$8 sps:$4 sm:$0xff]   ;;  %v5371_v41 = vld [vmem:[%s7453_s2 + $0x1c0] ss:$8 sps:$4 sm:$0xff]   ;;  %vm1266_vm10 = vcmask 1047556  }
   0xb   :  { %396 = vmatpush1.bf16.msra.mxu0 %v5353_v6  ;;  %v86_v32 = vor.u32 %v85_v28, %v82_v27  ;;  %v5372_v43 = vld [vmem:[%s7453_s2 + $0x1d4] ss:$8 sps:$4 sm:$0xff]   ;;  %v5985_v45 = vld [vmem:[%s7454_s0 + $0x8] sm:$0xf]  ;;  %v5990_v46 = vld [vmem:[%s7454_s0 + $0x20] sm:$0xf] }
   0xc   :  { %397 = vmatprep.subr.bf16.mxu0 %v5354_v7  ;;  %v115_v39 = vrot.slane %v114_v35, 4  ;;  %v4558_v47 = vcombine.low %v5985_v45, %v5990_v46  ;;  %v5374_v48 = vld [vmem:[%s7453_s2 + $0x1d0] ss:$8 sps:$4 sm:$0xff]   ;;  %v5375_v49 = vld [vmem:[%s7453_s2 + $0x1e4] ss:$8 sps:$4 sm:$0xff]   ;;  %v94_v61 = vshrl.u32 %v5985_v45, 16 }
   0xd   :  { %v87_v38 = vrot.slane %v86_v32, 4  ;;  %v5377_v50 = vld [vmem:[%s7453_s2 + $0x1e0] ss:$8 sps:$4 sm:$0xff]   ;;  %v5378_v51 = vld [vmem:[%s7453_s2 + $0x1f4] ss:$8 sps:$4 sm:$0xff]   ;;  %v97_v62 = vshll.u32 %v5985_v45, 16 }
   0xe   :  { %v120_v42 = vsel %vm5965_vm2, %v115_v39, %v119_v36  ;;  %v5380_v52 = vld [vmem:[%s7453_s2 + $0x1f0] ss:$8 sps:$4 sm:$0xff]   ;;  %v5381_v53 = vld [vmem:[%s7453_s2 + $0x204] ss:$8 sps:$4 sm:$0xff]   ;;  %v5383_v54 = vld [vmem:[%s7453_s2 + $0x200] ss:$8 sps:$4 sm:$0xff]  }
   0xf   :  { %398 = vmatpush1.bf16.msra.mxu0 %v5356_v8  ;;  %v92_v40 = vsel %vm5965_vm2, %v87_v38, %v91_v33  ;;  %v5384_v55 = vld [vmem:[%s7453_s2 + $0x214] ss:$8 sps:$4 sm:$0xff]   ;;  %v5386_v56 = vld [vmem:[%s7453_s2 + $0x210] ss:$8 sps:$4 sm:$0xff]   ;;  %v5387_v57 = vld [vmem:[%s7453_s2 + $0x224] ss:$8 sps:$4 sm:$0xff]  }
  0x10   :  { %399 = vmatprep.subr.bf16.mxu0 %v5357_v9  ;;  %v4513_v44 = vcombine.high %v92_v40, %v120_v42  ;;  %v5389_v58 = vld [vmem:[%s7453_s2 + $0x220] ss:$8 sps:$4 sm:$0xff]   ;;  %v5390_v59 = vld [vmem:[%s7453_s2 + $0x234] ss:$8 sps:$4 sm:$0xff]   ;;  %v5392_v60 = vld [vmem:[%s7453_s2 + $0x230] ss:$8 sps:$4 sm:$0xff]   ;;  %v4512_v4 = vcombine.low %v92_v40, %v120_v42 }
  0x11   :  { %v122_v63 = vshrl.u32 %v5990_v46, 16  ;;  %v125_v0 = vshll.u32 %v5990_v46, 16  ;;  %v5395_v2 = vld [vmem:[%s7453_s2 + $0x244] ss:$8 sps:$4 sm:$0xff]   ;;  %v5393_v3 = vld [vmem:[%s7453_s2 + $0x240] ss:$8 sps:$4 sm:$0xff]  }
  0x12   :  { %423 = vmatprep.mubr.bf16.mxu0 %v4513_v44  ;;  %v5398_v5 = vld [vmem:[%s7453_s2 + $0x254] ss:$8 sps:$4 sm:$0xff]   ;;  %v96_v6 = vrot.slane %v94_v61, 4  ;;  %v99_v7 = vrot.slane %v97_v62, 5  ;;  %v5401_v22 = vld [vmem:[%s7453_s2 + $0x264] ss:$8 sps:$4 sm:$0xff]  }
  0x13   :  { %400 = vmatpush1.bf16.msra.mxu0 %v5359_v10  ;;  %v124_v8 = vrot.slane %v122_v63, 4  ;;  %v127_v9 = vrot.slane %v125_v0, 5  ;;  %v6049_v10 = vld [vmem:[%s7454_s0 + $0x14] sm:$0x1]  ;;  %v5399_v23 = vld [vmem:[%s7453_s2 + $0x260] ss:$8 sps:$4 sm:$0xff]  }
  0x14   :  { %401 = vmatprep.subr.bf16.mxu0 %v5360_v11  ;;  %v6054_v11 = vld [vmem:[%s7454_s0 + $0x2c] sm:$0x1]  ;;  %v5404_v28 = vld [vmem:[%s7453_s2 + $0x274] ss:$8 sps:$4 sm:$0xff]   ;;  %v5402_v29 = vld [vmem:[%s7453_s2 + $0x270] ss:$8 sps:$4 sm:$0xff]  }
  0x15   :  { %v128_v19 = vor.u32 %v127_v9, %v124_v8  ;;  %v131_v20 = vshll.u32 %v6054_v11, 16  ;;  %v5407_v30 = vld [vmem:[%s7453_s2 + $0x4] ss:$8 sps:$4 sm:$0xff]   ;;  %v5405_v35 = vld [vmem:[%s7453_s2] ss:$8 sps:$4 sm:$0xff]   ;;  %v798_v42 = vrot.slane %v5943_v17, 5 }
  0x16   :  { %v5410_v36 = vld [vmem:[%s7453_s2 + $0x14] ss:$8 sps:$4 sm:$0xff]   ;;  %v5408_v38 = vld [vmem:[%s7453_s2 + $0x10] ss:$8 sps:$4 sm:$0xff]   ;;  %v5413_v39 = vld [vmem:[%s7453_s2 + $0x24] ss:$8 sps:$4 sm:$0xff]  }
  0x17   :  { %402 = vmatpush1.bf16.msra.mxu0 %v5362_v12  ;;  %v5396_v12 = vld [vmem:[%s7453_s2 + $0x250] ss:$8 sps:$4 sm:$0xff]   ;;  %v133_v27 = vrot.slane %v131_v20, 5  ;;  %v5411_v40 = vld [vmem:[%s7453_s2 + $0x20] ss:$8 sps:$4 sm:$0xff]   ;;  %vm1278_vm12 = vcmask 1040384  }
  0x18   :  { %403 = vmatprep.subr.bf16.mxu0 %v5363_v13  ;;  %v100_v13 = vor.u32 %v99_v7, %v96_v6  ;;  %v5414_v44 = vld [vmem:[%s7453_s2 + $0x30] ss:$8 sps:$4 sm:$0xff]   ;;  %v5428_v61 = vld [vmem:[%s7453_s2 + $0x74] ss:$8 sps:$4 sm:$0xff]   ;;  %v5431_v63 = vld [vmem:[%s7453_s2 + $0x84] ss:$8 sps:$4 sm:$0xff]  }
  0x19   :  { %v783_v17 = vld [vmem:[%s7454_s0 + $0x18] sm:$0xee]  ;;  %v5429_v0 = vld [vmem:[%s7453_s2 + $0x80] ss:$8 sps:$4 sm:$0xff]   ;;  %v5443_v8 = vld [vmem:[%s7453_s2 + $0xc4] ss:$8 sps:$4 sm:$0xff]  }
  0x1a   :  { %v101_v24 = vrot.slane %v100_v13, 4  ;;  %v5426_v62 = vld [vmem:[%s7453_s2 + $0x70] ss:$8 sps:$4 sm:$0xff]   ;;  %v5440_v6 = vld [vmem:[%s7453_s2 + $0xb4] ss:$8 sps:$4 sm:$0xff]   ;;  %vm1281_vm15 = vcmask 1044484  }
  0x1b   :  { %404 = vmatpush1.bf16.msra.mxu0 %v5365_v14  ;;  %v103_v14 = vshll.u32 %v6049_v10, 16  ;;  %v5438_v7 = vld [vmem:[%s7453_s2 + $0xb0] ss:$8 sps:$4 sm:$0xff]   ;;  %v5441_v9 = vld [vmem:[%s7453_s2 + $0xc0] ss:$8 sps:$4 sm:$0xff]   ;;  %vm1273_vm4 = vcmask 519168  }
  0x1c   :  { %405 = vmatprep.subr.bf16.mxu0 %v5366_v26  ;;  %v129_v26 = vrot.slane %v128_v19, 4  ;;  %v5444_v13 = vld [vmem:[%s7453_s2 + $0xd0] ss:$8 sps:$4 sm:$0xff]   ;;  %v5447_v19 = vld [vmem:[%s7453_s2 + $0xe0] ss:$8 sps:$4 sm:$0xff]  }
  0x1d   :  { %v105_v25 = vrot.slane %v103_v14, 5  ;;  %v5449_v14 = vld [vmem:[%s7453_s2 + $0xe4] ss:$8 sps:$4 sm:$0xff]   ;;  %v5452_v20 = vld [vmem:[%s7453_s2 + $0xf4] ss:$8 sps:$4 sm:$0xff]  }
  0x1e   :  { %v134_v32 = vsel %vm5965_vm2, %v129_v26, %v133_v27  ;;  %v5458_v26 = vld [vmem:[%s7453_s2 + $0x110] ss:$8 sps:$4 sm:$0xff]   ;;  %v5463_v27 = vld [vmem:[%s7453_s2 + $0x124] ss:$8 sps:$4 sm:$0xff]   ;;  %v5474_v45 = vld [vmem:[%s7453_s2 + $0x2a0] ss:$8 sps:$4 sm:$0xff]  }
  0x1f   :  { %406 = vmatpush1.bf16.msra.mxu0 %v5368_v31  ;;  %v106_v31 = vsel %vm5965_vm2, %v101_v24, %v105_v25  ;;  %v5454_v24 = vld [vmem:[%s7453_s2 + $0x100] ss:$8 sps:$4 sm:$0xff]   ;;  %v5460_v25 = vld [vmem:[%s7453_s2 + $0x114] ss:$8 sps:$4 sm:$0xff]   ;;  %vm1264_vm8 = vsmask.f32 7938 }
  0x20   :  { %407 = vmatprep.subr.bf16.mxu0 %v5369_v37  ;;  %v4514_v33 = vcombine.low %v106_v31, %v134_v32  ;;  %v4557_v37 = vcombine.high %v5933_v15, %v5938_v16  ;;  %v5466_v15 = vld [vmem:[%s7453_s2 + $0x134] ss:$8 sps:$4 sm:$0xff]   ;;  %v5464_v16 = vld [vmem:[%s7453_s2 + $0x130] ss:$8 sps:$4 sm:$0xff]   ;;  %v5476_v32 = vld [vmem:[%s7453_s2 + $0x2a4] ss:$8 sps:$4 sm:$0xff]  }
  0x21   :  { %v5471_v31 = vld [vmem:[%s7453_s2 + $0x290] ss:$8 sps:$4 sm:$0xff]   ;;  %v5479_v46 = vld [vmem:[%s7453_s2 + $0x2b4] ss:$8 sps:$4 sm:$0xff]   ;;  %vm7462_vm11 = vsmask.f32 7954  ;;  %vm6492_vm14 = vmand %vm1263_vm7, %vm1264_vm8 }
  0x22   :  { %vm1279_vm13 = vsmask.f32 256  ;;  %vm1282_vm0 = vsmask.f32 4352  ;;  %vm6498_vm1 = vmand %vm1266_vm10, %vm7462_vm11  ;;  %v4919_v34 = vld [vmem:[%s7458_s6 + $0x8] ss:$0 sm:$0xff] }
  0x23   :  { %408 = vmatpush1.bf16.msra.mxu0 %v5371_v41  ;;  %v5416_v41 = vld [vmem:[%s7453_s2 + $0x34] ss:$8 sps:$4 sm:$0xff]   ;;  %vm6506_vm5 = vmand %vm1278_vm12, %vm1279_vm13 }
  0x24   :  { %409 = vmatprep.subr.bf16.mxu0 %v5372_v43  ;;  %v806_v43 = vrot.slane %v5948_v18, 5  ;;  %vm1283_vm7 = vmand %vm1281_vm15, %vm1282_vm0 }
  0x25   :  { %vm1269_vm10 = vmor %vm6498_vm1, %vm6492_vm14 }
  0x26   :  { %vm6519_vm11 = vmand %vm1273_vm4, %vm1264_vm8 }
  0x27   :  { %410 = vmatpush1.bf16.msra.mxu0 %v5374_v48  ;;  %v5419_v48 = vld [vmem:[%s7453_s2 + $0x44] ss:$8 sps:$4 sm:$0xff]   ;;  %vm6525_vm0 = vmor %vm1283_vm7, %vm6506_vm5  ;;  %vm7481_vm5 = vsmask.f32 7954 }
  0x28   :  { %411 = vmatprep.subr.bf16.mxu0 %v5375_v49  ;;  %v781_v49 = vld [vmem:[%s7454_s0] sm:$0xee]  ;;  %vm6554_vm7 = vmand %vm1281_vm15, %vm7481_vm5  ;;  %vm2992_vm15 = vcmask 64512  }
  0x29   :  { %v4600_v18 = vrot.slane %v781_v49, 9  ;;  %v5500_v49 = vld [vmem:[%s7453_s2 + $0x324] ss:$8 sps:$4 sm:$0xff]  }
  0x2b   :  { %412 = vmatpush1.bf16.msra.mxu0 %v5377_v50  ;;  %v4602_v50 = vrot.slane %v783_v17, 9  ;;  %v5498_v17 = vld [vmem:[%s7453_s2 + $0x320] ss:$8 sps:$4 sm:$0xff]  }
  0x2c   :  { %413 = vmatprep.subr.bf16.mxu0 %v5378_v51 }
  0x2f   :  { %414 = vmatpush1.bf16.msra.mxu0 %v5380_v52  ;;  %v5417_v52 = vld [vmem:[%s7453_s2 + $0x40] ss:$8 sps:$4 sm:$0xff]  }
  0x30   :  { %415 = vmatprep.subr.bf16.mxu0 %v5381_v53  ;;  %v6125_v53 = vsel %vm6116_vm6, %v4600_v18, %v798_v42  ;;  %v5494_v42 = vld [vmem:[%s7453_s2 + $0x304] ss:$8 sps:$4 sm:$0xff]   ;;  %v5503_v18 = vld [vmem:[%s7453_s2 + $0x334] ss:$8 sps:$4 sm:$0xff]  }
  0x33   :  { %416 = vmatpush1.bf16.msra.mxu0 %v5383_v54  ;;  %v6129_v54 = vsel %vm6116_vm6, %v4602_v50, %v806_v43  ;;  %v5492_v43 = vld [vmem:[%s7453_s2 + $0x300] ss:$8 sps:$4 sm:$0xff]   ;;  %v5501_v50 = vld [vmem:[%s7453_s2 + $0x330] ss:$8 sps:$4 sm:$0xff]  }
  0x34   :  { %417 = vmatprep.subr.bf16.mxu0 %v5384_v55  ;;  %v5422_v55 = vld [vmem:[%s7453_s2 + $0x54] ss:$8 sps:$4 sm:$0xff]  }
  0x37   :  { %418 = vmatpush1.bf16.msra.mxu0 %v5386_v56  ;;  %v4644_v56 = vcombine.low %v6125_v53, %v6129_v54 }
  0x38   :  { %419 = vmatprep.subr.bf16.mxu0 %v5387_v57  ;;  %v4645_v57 = vcombine.high %v6125_v53, %v6129_v54  ;;  %v784_v53 = vld [vmem:[%s7454_s0 + $0x20] sm:$0xe] }
  0x39   :  { %v5522_v54 = vld [vmem:[%s7453_s2 + $0x3a0] ss:$8 sps:$4 sm:$0xff]  }
  0x3b   :  { %420 = vmatpush1.bf16.msra.mxu0 %v5389_v58  ;;  %v5420_v58 = vld [vmem:[%s7453_s2 + $0x50] ss:$8 sps:$4 sm:$0xff]  }
  0x3c   :  { %421 = vmatprep.subr.bf16.mxu0 %v5390_v59  ;;  %v5425_v59 = vld [vmem:[%s7453_s2 + $0x64] ss:$8 sps:$4 sm:$0xff]  }
  0x3f   :  { %422 = vmatpush1.bf16.msra.mxu0 %v5392_v60  ;;  %v5423_v60 = vld [vmem:[%s7453_s2 + $0x60] ss:$8 sps:$4 sm:$0xff]  }
  0x40   :  { %434 = vmatprep.subr.bf16.mxu0 %v5395_v2  ;;  %v5434_v2 = vld [vmem:[%s7453_s2 + $0x94] ss:$8 sps:$4 sm:$0xff]  }
  0x42   :  { %424 = vmatmul.mubr.bf16.vlgmr.msra.gmra.mrb[0].mxu0 %v4512_v4  ;;  %v5437_v4 = vld [vmem:[%s7453_s2 + $0xa4] ss:$8 sps:$4 sm:$0xff]  }
  0x43   :  { %435 = vmatpush1.bf16.msra.mxu0 %v5393_v3  ;;  %466 = vmatprep.mubr.bf16.mxu0 %v5839_v1  ;;  %v5432_v3 = vld [vmem:[%s7453_s2 + $0x90] ss:$8 sps:$4 sm:$0xff]  }
  0x44   :  { %436 = vmatprep.subr.bf16.mxu0 %v5398_v5  ;;  %v5435_v5 = vld [vmem:[%s7453_s2 + $0xa0] ss:$8 sps:$4 sm:$0xff]  }
  0x47   :  { %437 = vmatpush1.bf16.msra.mxu0 %v5396_v12  ;;  %v5446_v12 = vld [vmem:[%s7453_s2 + $0xd4] ss:$8 sps:$4 sm:$0xff]  }
  0x48   :  { %438 = vmatprep.subr.bf16.mxu0 %v5401_v22  ;;  %v5450_v22 = vld [vmem:[%s7453_s2 + $0xf0] ss:$8 sps:$4 sm:$0xff]  }
  0x4b   :  { %439 = vmatpush1.bf16.msra.mxu0 %v5399_v23  ;;  %v5456_v23 = vld [vmem:[%s7453_s2 + $0x104] ss:$8 sps:$4 sm:$0xff]  }
  0x4c   :  { %440 = vmatprep.subr.bf16.mxu0 %v5404_v28  ;;  %v5461_v28 = vld [vmem:[%s7453_s2 + $0x120] ss:$8 sps:$4 sm:$0xff]  }
  0x4f   :  { %441 = vmatpush1.bf16.msra.mxu0 %v5402_v29  ;;  %v5467_v29 = vld [vmem:[%s7453_s2 + $0x280] ss:$8 sps:$4 sm:$0xff]  }
  0x50   :  { %695 = vmatprep.subr.bf16.mxu0 %v5407_v30  ;;  %v5473_v30 = vld [vmem:[%s7453_s2 + $0x294] ss:$8 sps:$4 sm:$0xff]  }
  0x52   :  { %4555 = vmatmul.mubr.msk.bf16.vlgmr.msra.gmra.mrb[0].mxu0 %vm7461_vm3, %v4514_v33  ;;  %v5482_v33 = vld [vmem:[%s7453_s2 + $0x2c4] ss:$8 sps:$4 sm:$0xff]  }
  0x53   :  { %696 = vmatpush1.bf16.msra.mxu0 %v5405_v35  ;;  %727 = vmatprep.mubr.bf16.mxu0 %v4557_v37  ;;  %v5480_v35 = vld [vmem:[%s7453_s2 + $0x2c0] ss:$8 sps:$4 sm:$0xff]   ;;  %v5483_v37 = vld [vmem:[%s7453_s2 + $0x2d0] ss:$8 sps:$4 sm:$0xff]  }
  0x54   :  { %697 = vmatprep.subr.bf16.mxu0 %v5410_v36  ;;  %v5485_v36 = vld [vmem:[%s7453_s2 + $0x2d4] ss:$8 sps:$4 sm:$0xff]  }
  0x57   :  { %698 = vmatpush1.bf16.msra.mxu0 %v5408_v38  ;;  %v5488_v38 = vld [vmem:[%s7453_s2 + $0x2e4] ss:$8 sps:$4 sm:$0xff]  }
  0x58   :  { %699 = vmatprep.subr.bf16.mxu0 %v5413_v39  ;;  %v5486_v39 = vld [vmem:[%s7453_s2 + $0x2e0] ss:$8 sps:$4 sm:$0xff]  }
  0x5b   :  { %700 = vmatpush1.bf16.msra.mxu0 %v5411_v40  ;;  %v5491_v40 = vld [vmem:[%s7453_s2 + $0x2f4] ss:$8 sps:$4 sm:$0xff]  }
  0x5c   :  { %701 = vmatprep.subr.bf16.mxu0 %v5416_v41  ;;  %v5489_v41 = vld [vmem:[%s7453_s2 + $0x2f0] ss:$8 sps:$4 sm:$0xff]  }
  0x5f   :  { %702 = vmatpush1.bf16.msra.mxu0 %v5414_v44  ;;  %v5497_v44 = vld [vmem:[%s7453_s2 + $0x314] ss:$8 sps:$4 sm:$0xff]  }
  0x60   :  { %703 = vmatprep.subr.bf16.mxu0 %v5419_v48  ;;  %v5495_v48 = vld [vmem:[%s7453_s2 + $0x310] ss:$8 sps:$4 sm:$0xff]  }
  0x63   :  { %704 = vmatpush1.bf16.msra.mxu0 %v5417_v52  ;;  %v5506_v52 = vld [vmem:[%s7453_s2 + $0x344] ss:$8 sps:$4 sm:$0xff]  }
  0x64   :  { %705 = vmatprep.subr.bf16.mxu0 %v5422_v55  ;;  %v5504_v55 = vld [vmem:[%s7453_s2 + $0x340] ss:$8 sps:$4 sm:$0xff]  }
  0x67   :  { %706 = vmatpush1.bf16.msra.mxu0 %v5420_v58  ;;  %v5507_v58 = vld [vmem:[%s7453_s2 + $0x350] ss:$8 sps:$4 sm:$0xff]  }
  0x68   :  { %707 = vmatprep.subr.bf16.mxu0 %v5425_v59  ;;  %v5512_v59 = vld [vmem:[%s7453_s2 + $0x364] ss:$8 sps:$4 sm:$0xff]  }
  0x6b   :  { %708 = vmatpush1.bf16.msra.mxu0 %v5423_v60  ;;  %v5510_v60 = vld [vmem:[%s7453_s2 + $0x360] ss:$8 sps:$4 sm:$0xff]  }
  0x6c   :  { %709 = vmatprep.subr.bf16.mxu0 %v5428_v61  ;;  %v5515_v61 = vld [vmem:[%s7453_s2 + $0x374] ss:$8 sps:$4 sm:$0xff]  }
  0x6f   :  { %710 = vmatpush1.bf16.msra.mxu0 %v5426_v62  ;;  %v5513_v62 = vld [vmem:[%s7453_s2 + $0x370] ss:$8 sps:$4 sm:$0xff]  }
  0x70   :  { %711 = vmatprep.subr.bf16.mxu0 %v5431_v63  ;;  %v5518_v63 = vld [vmem:[%s7453_s2 + $0x384] ss:$8 sps:$4 sm:$0xff]  }
  0x73   :  { %712 = vmatpush1.bf16.msra.mxu0 %v5429_v0  ;;  %v5516_v0 = vld [vmem:[%s7453_s2 + $0x380] ss:$8 sps:$4 sm:$0xff]  }
  0x74   :  { %713 = vmatprep.subr.bf16.mxu0 %v5434_v2  ;;  %v5521_v2 = vld [vmem:[%s7453_s2 + $0x394] ss:$8 sps:$4 sm:$0xff]  }
  0x77   :  { %714 = vmatpush1.bf16.msra.mxu0 %v5432_v3  ;;  %v5519_v3 = vld [vmem:[%s7453_s2 + $0x390] ss:$8 sps:$4 sm:$0xff]  }
  0x78   :  { %715 = vmatprep.subr.bf16.mxu0 %v5437_v4  ;;  %v5524_v4 = vld [vmem:[%s7453_s2 + $0x3a4] ss:$8 sps:$4 sm:$0xff]  }
  0x7b   :  { %716 = vmatpush1.bf16.msra.mxu0 %v5435_v5  ;;  %v782_v5 = vld [vmem:[%s7454_s0 + $0x8] sm:$0xe] }
  0x7c   :  { %717 = vmatprep.subr.bf16.mxu0 %v5440_v6  ;;  %v802_v6 = vrot.slane %v6049_v10, 5 }
  0x7f   :  { %718 = vmatpush1.bf16.msra.mxu0 %v5438_v7  ;;  %v4603_v7 = vrot.slane %v784_v53, 9  ;;  %v5569_v53 = vld [vmem:[%s7455_s3 + $0x210] ss:$8 sps:$4 sm:$0xff]  }
  0x80   :  { %719 = vmatprep.subr.bf16.mxu0 %v5443_v8  ;;  %v810_v8 = vrot.slane %v6054_v11, 5  ;;  %v5528_v11 = vld [vmem:[%s7455_s3 + $0x144] ss:$8 sps:$4 sm:$0xff]  }
  0x81   :  { %1694 = vmatprep.subr.bf16.mxu1 %v5528_v11 }
  0x83   :  { %720 = vmatpush1.bf16.msra.mxu0 %v5441_v9  ;;  %v5527_v9 = vld [vmem:[%s7453_s2 + $0x3b4] ss:$8 sps:$4 sm:$0xff]  }
  0x84   :  { %721 = vmatprep.subr.bf16.mxu0 %v5446_v12  ;;  %v5525_v12 = vld [vmem:[%s7453_s2 + $0x3b0] ss:$8 sps:$4 sm:$0xff]  }
  0x87   :  { %722 = vmatpush1.bf16.msra.mxu0 %v5444_v13 }
  0x88   :  { %723 = vmatprep.subr.bf16.mxu0 %v5449_v14  ;;  %v811_v14 = vsel %vm6116_vm6, %v4603_v7, %v810_v8  ;;  %v5575_v7 = vld [vmem:[%s7455_s3 + $0x230] ss:$8 sps:$4 sm:$0xff]   ;;  %v5578_v8 = vld [vmem:[%s7455_s3 + $0x244] ss:$8 sps:$4 sm:$0xff]  }
  0x8b   :  { %724 = vmatpush1.bf16.msra.mxu0 %v5447_v19  ;;  %v5530_v19 = vld [vmem:[%s7455_s3 + $0x140] ss:$8 sps:$4 sm:$0xff]  }
  0x8c   :  { %725 = vmatprep.subr.bf16.mxu0 %v5452_v20  ;;  %v5531_v20 = vld [vmem:[%s7455_s3 + $0x154] ss:$8 sps:$4 sm:$0xff]   ;;  %1695 = vmatpush1.bf16.msra.mxu1 %v5530_v19 }
  0x8d   :  { %1696 = vmatprep.subr.bf16.mxu1 %v5531_v20 }
  0x8f   :  { %726 = vmatpush1.bf16.msra.mxu0 %v5450_v22  ;;  %v5533_v22 = vld [vmem:[%s7455_s3 + $0x150] ss:$8 sps:$4 sm:$0xff]  }
  0x90   :  { %738 = vmatprep.subr.bf16.mxu0 %v5456_v23  ;;  %v5534_v23 = vld [vmem:[%s7455_s3 + $0x164] ss:$8 sps:$4 sm:$0xff]   ;;  %1697 = vmatpush1.bf16.msra.mxu1 %v5533_v22 }
  0x91   :  { %1698 = vmatprep.subr.bf16.mxu1 %v5534_v23 }
  0x92   :  { %728 = vmatmul.mubr.bf16.vlgmr.msra.gmra.mrb[0].mxu0 %v4556_v21  ;;  %v5469_v21 = vld [vmem:[%s7453_s2 + $0x284] ss:$8 sps:$4 sm:$0xff]  }
  0x93   :  { %739 = vmatpush1.bf16.msra.mxu0 %v5454_v24  ;;  %770 = vmatprep.mubr.bf16.mxu0 %v5839_v1  ;;  %v5536_v24 = vld [vmem:[%s7455_s3 + $0x160] ss:$8 sps:$4 sm:$0xff]  }
  0x94   :  { %740 = vmatprep.subr.bf16.mxu0 %v5460_v25  ;;  %v5537_v25 = vld [vmem:[%s7455_s3 + $0x174] ss:$8 sps:$4 sm:$0xff]   ;;  %1699 = vmatpush1.bf16.msra.mxu1 %v5536_v24 }
  0x95   :  { %1700 = vmatprep.subr.bf16.mxu1 %v5537_v25 }
  0x97   :  { %741 = vmatpush1.bf16.msra.mxu0 %v5458_v26  ;;  %v5539_v26 = vld [vmem:[%s7455_s3 + $0x170] ss:$8 sps:$4 sm:$0xff]  }
  0x98   :  { %742 = vmatprep.subr.bf16.mxu0 %v5463_v27  ;;  %v5540_v27 = vld [vmem:[%s7455_s3 + $0x184] ss:$8 sps:$4 sm:$0xff]   ;;  %1701 = vmatpush1.bf16.msra.mxu1 %v5539_v26 }
  0x99   :  { %1702 = vmatprep.subr.bf16.mxu1 %v5540_v27 }
  0x9b   :  { %743 = vmatpush1.bf16.msra.mxu0 %v5461_v28  ;;  %v5542_v28 = vld [vmem:[%s7455_s3 + $0x180] ss:$8 sps:$4 sm:$0xff]  }
  0x9c   :  { %744 = vmatprep.subr.bf16.mxu0 %v5466_v15  ;;  %1703 = vmatpush1.bf16.msra.mxu1 %v5542_v28  ;;  %v1158_v15 = vlaneseq }
  0x9f   :  { %745 = vmatpush1.bf16.msra.mxu0 %v5464_v16  ;;  %v6403_v16 = vshrl.u32 %v1158_v15, 7 }
  0xa0   :  { %1067 = vmatprep.subr.bf16.mxu0 %v5469_v21  ;;  %v5543_v21 = vld [vmem:[%s7455_s3 + $0x194] ss:$8 sps:$4 sm:$0xff]  }
  0xa1   :  { %1704 = vmatprep.subr.bf16.mxu1 %v5543_v21 }
  0xa2   :  { %4599 = vmatmul.mubr.msk.bf16.vlgmr.msra.gmra.mrb[0].mxu0 %vm7461_vm3, %v4558_v47  ;;  %v5477_v47 = vld [vmem:[%s7453_s2 + $0x2b0] ss:$8 sps:$4 sm:$0xff]  }
  0xa3   :  { %1068 = vmatpush1.bf16.msra.mxu0 %v5467_v29  ;;  %1099 = vmatprep.mubr.bf16.mxu0 %v4645_v57  ;;  %v5509_v57 = vld [vmem:[%s7453_s2 + $0x354] ss:$8 sps:$4 sm:$0xff]   ;;  %v6409_v29 = vsub.s32 0, %v6403_v16 }
  0xa4   :  { %1069 = vmatprep.subr.bf16.mxu0 %v5473_v30  ;;  %v5545_v30 = vld [vmem:[%s7455_s3 + $0x190] ss:$8 sps:$4 sm:$0xff]  }
  0xa5   :  { %1705 = vmatpush1.bf16.msra.mxu1 %v5545_v30 }
  0xa7   :  { %1070 = vmatpush1.bf16.msra.mxu0 %v5471_v31  ;;  %v27_v31 = vld [vmem:[%s7456_s4] ss:$2 sm:$0x3] }
  0xa8   :  { %1071 = vmatprep.subr.bf16.mxu0 %v5476_v32  ;;  %v6418_v32 = vsub.s32 1, %v6403_v16 }
  0xab   :  { %1072 = vmatpush1.bf16.msra.mxu0 %v5474_v45  ;;  %v1161_v45 = vrot.slane %v27_v31, %v6409_v29 }
  0xac   :  { %1073 = vmatprep.subr.bf16.mxu0 %v5479_v46  ;;  %v1165_v46 = vrot.slane %v27_v31, %v6418_v32 }
  0xaf   :  { %1074 = vmatpush1.bf16.msra.mxu0 %v5477_v47  ;;  %v5546_v47 = vld [vmem:[%s7455_s3 + $0x1a4] ss:$8 sps:$4 sm:$0xff]  }
  0xb0   :  { %1075 = vmatprep.subr.bf16.mxu0 %v5482_v33  ;;  %1706 = vmatprep.subr.bf16.mxu1 %v5546_v47 }
  0xb3   :  { %1076 = vmatpush1.bf16.msra.mxu0 %v5480_v35  ;;  %v5548_v35 = vld [vmem:[%s7455_s3 + $0x1a0] ss:$8 sps:$4 sm:$0xff]  }
  0xb4   :  { %1077 = vmatprep.subr.bf16.mxu0 %v5485_v36  ;;  %1707 = vmatpush1.bf16.msra.mxu1 %v5548_v35 }
  0xb7   :  { %1078 = vmatpush1.bf16.msra.mxu0 %v5483_v37 }
  0xb8   :  { %1079 = vmatprep.subr.bf16.mxu0 %v5488_v38 }
  0xbb   :  { %1080 = vmatpush1.bf16.msra.mxu0 %v5486_v39 }
  0xbc   :  { %1081 = vmatprep.subr.bf16.mxu0 %v5491_v40  ;;  %v5549_v40 = vld [vmem:[%s7455_s3 + $0x1b4] ss:$8 sps:$4 sm:$0xff]  }
  0xbd   :  { %1708 = vmatprep.subr.bf16.mxu1 %v5549_v40 }
  0xbf   :  { %1082 = vmatpush1.bf16.msra.mxu0 %v5489_v41 }
  0xc0   :  { %1083 = vmatprep.subr.bf16.mxu0 %v5494_v42 }
  0xc3   :  { %1084 = vmatpush1.bf16.msra.mxu0 %v5492_v43 }
  0xc4   :  { %1085 = vmatprep.subr.bf16.mxu0 %v5497_v44  ;;  %v5551_v44 = vld [vmem:[%s7455_s3 + $0x1b0] ss:$8 sps:$4 sm:$0xff]  }
  0xc5   :  { %1709 = vmatpush1.bf16.msra.mxu1 %v5551_v44  ;;  %v1290_v44 = vld [vmem:[#allocation2 + $0x14] sm:$0x1] }
  0xc7   :  { %1086 = vmatpush1.bf16.msra.mxu0 %v5495_v48 }
  0xc8   :  { %1087 = vmatprep.subr.bf16.mxu0 %v5500_v49 }
  0xcb   :  { %1088 = vmatpush1.bf16.msra.mxu0 %v5498_v17 }
  0xcc   :  { %1089 = vmatprep.subr.bf16.mxu0 %v5503_v18 }
  0xcf   :  { %1090 = vmatpush1.bf16.msra.mxu0 %v5501_v50  ;;  %v5552_v50 = vld [vmem:[%s7455_s3 + $0x1c4] ss:$8 sps:$4 sm:$0xff]  }
  0xd0   :  { %1091 = vmatprep.subr.bf16.mxu0 %v5506_v52  ;;  %1710 = vmatprep.subr.bf16.mxu1 %v5552_v50 }
  0xd3   :  { %1092 = vmatpush1.bf16.msra.mxu0 %v5504_v55 }
  0xd4   :  { %1093 = vmatprep.subr.bf16.mxu0 %v5509_v57  ;;  %v5554_v57 = vld [vmem:[%s7455_s3 + $0x1c0] ss:$8 sps:$4 sm:$0xff]  }
  0xd5   :  { %1711 = vmatpush1.bf16.msra.mxu1 %v5554_v57 }
  0xd7   :  { %1094 = vmatpush1.bf16.msra.mxu0 %v5507_v58 }
  0xd8   :  { %1095 = vmatprep.subr.bf16.mxu0 %v5512_v59  ;;  %v5555_v59 = vld [vmem:[%s7455_s3 + $0x1d4] ss:$8 sps:$4 sm:$0xff]  }
  0xd9   :  { %1712 = vmatprep.subr.bf16.mxu1 %v5555_v59 }
  0xdb   :  { %1096 = vmatpush1.bf16.msra.mxu0 %v5510_v60 }
  0xdc   :  { %1097 = vmatprep.subr.bf16.mxu0 %v5515_v61  ;;  %v5557_v61 = vld [vmem:[%s7455_s3 + $0x1d0] ss:$8 sps:$4 sm:$0xff]  }
  0xdd   :  { %1713 = vmatpush1.bf16.msra.mxu1 %v5557_v61 }
  0xdf   :  { %1098 = vmatpush1.bf16.msra.mxu0 %v5513_v62  ;;  %v5558_v62 = vld [vmem:[%s7455_s3 + $0x1e4] ss:$8 sps:$4 sm:$0xff]  }
  0xe0   :  { %1110 = vmatprep.subr.bf16.mxu0 %v5518_v63  ;;  %v5560_v63 = vld [vmem:[%s7455_s3 + $0x1e0] ss:$8 sps:$4 sm:$0xff]   ;;  %1714 = vmatprep.subr.bf16.mxu1 %v5558_v62 }
  0xe1   :  { %1715 = vmatpush1.bf16.msra.mxu1 %v5560_v63 }
  0xe2   :  { %1100 = vmatmul.mubr.bf16.vlgmr.msra.gmra.mrb[0].mxu0 %v4644_v56  ;;  %v4601_v56 = vrot.slane %v782_v5, 9  ;;  %v5567_v5 = vld [vmem:[%s7455_s3 + $0x214] ss:$8 sps:$4 sm:$0xff]  }
  0xe3   :  { %1111 = vmatpush1.bf16.msra.mxu0 %v5516_v0  ;;  %1142 = vmatprep.mubr.bf16.mxu0 %v5839_v1  ;;  %v5561_v0 = vld [vmem:[%s7455_s3 + $0x1f4] ss:$8 sps:$4 sm:$0xff]  }
  0xe4   :  { %1112 = vmatprep.subr.bf16.mxu0 %v5521_v2  ;;  %v803_v13 = vsel %vm6116_vm6, %v4601_v56, %v802_v6  ;;  %v5563_v2 = vld [vmem:[%s7455_s3 + $0x1f0] ss:$8 sps:$4 sm:$0xff]   ;;  %1716 = vmatprep.subr.bf16.mxu1 %v5561_v0  ;;  %v5572_v56 = vld [vmem:[%s7455_s3 + $0x220] ss:$8 sps:$4 sm:$0xff]   ;;  %v5573_v6 = vld [vmem:[%s7455_s3 + $0x234] ss:$8 sps:$4 sm:$0xff]  }
  0xe5   :  { %v4646_v10 = vcombine.low %v803_v13, %v811_v14  ;;  %1717 = vmatpush1.bf16.msra.mxu1 %v5563_v2  ;;  %v5841_v13 = vmov 1   ;;  %v1296_v2 = vld [vmem:[#allocation2 + $0x20] sm:$0xf] }
  0xe7   :  { %1113 = vmatpush1.bf16.msra.mxu0 %v5519_v3  ;;  %v5564_v3 = vld [vmem:[%s7455_s3 + $0x204] ss:$8 sps:$4 sm:$0xff]  }
  0xe8   :  { %1114 = vmatprep.subr.bf16.mxu0 %v5524_v4  ;;  %v5566_v4 = vld [vmem:[%s7455_s3 + $0x200] ss:$8 sps:$4 sm:$0xff]   ;;  %1718 = vmatprep.subr.bf16.mxu1 %v5564_v3 }
  0xe9   :  { %1719 = vmatpush1.bf16.msra.mxu1 %v5566_v4  ;;  %v1299_v3 = vld [vmem:[#allocation2 + $0x24] sm:$0x11]  ;;  %v1302_v4 = vld [vmem:[#allocation2 + $0x2c] sm:$0x1] }
  0xea   :  { %1720 = vmatprep.subr.bf16.mxu1 %v5567_v5 }
  0xeb   :  { %1115 = vmatpush1.bf16.msra.mxu0 %v5522_v54  ;;  %v5570_v54 = vld [vmem:[%s7455_s3 + $0x224] ss:$8 sps:$4 sm:$0xff]  }
  0xec   :  { %1116 = vmatprep.subr.bf16.mxu0 %v5527_v9  ;;  %v2502_v9 = vld [vmem:[%s7457_s1] sm:$0x1] }
  0xed   :  { %1721 = vmatpush1.bf16.msra.mxu1 %v5569_v53 }
  0xee   :  { %1722 = vmatprep.subr.bf16.mxu1 %v5570_v54 }
  0xef   :  { %1117 = vmatpush1.bf16.msra.mxu0 %v5525_v12  ;;  %v2503_v12 = vld [vmem:[%s7457_s1 + $0x1] sm:$0x1] }
  0xf1   :  { %1723 = vmatpush1.bf16.msra.mxu1 %v5572_v56 }
  0xf2   :  { %4687 = vmatmul.mubr.msk.bf16.vlgmr.msra.gmra.mrb[0].mxu0 %vm7461_vm3, %v4646_v10  ;;  %1724 = vmatprep.subr.bf16.mxu1 %v5573_v6  ;;  %vm1288_vm3 = vcmask 516096  }
  0xf3   :  { %vm6531_vm4 = vmand %vm1288_vm3, %vm1279_vm13 }
  0xf4   :  { %vm6548_vm13 = vmand %vm1278_vm12, %vm1264_vm8 }
  0xf5   :  { %1725 = vmatpush1.bf16.msra.mxu1 %v5575_v7  ;;  %vm1319_vm12 = vmor %vm6554_vm7, %vm6548_vm13 }
  0xf6   :  { %1737 = vmatprep.subr.bf16.mxu1 %v5578_v8  ;;  %vm6575_vm14 = vmand %vm1288_vm3, %vm1264_vm8  ;;  %vm2661_vm3 = vcmask 130048  }
 0x1c5   :  { %v1144_v33 = vpop.f32.mrb[0].mxu0 }
 0x1c6   :  { %v1168_v36 = vadd.f32 %v1161_v45, %v1144_v33  ;;  %v1146_v37 = vpop.f32.mrb[1].mxu0 }
 0x1c7   :  { %v1169_v38 = vadd.f32 %v1165_v46, %v1146_v37  ;;  %v1148_v39 = vpop.f32.mrb[2].mxu0 }
 0x1c8   :  { %v1172_v41 = vmax.f32 %v1168_v36, 0.0  ;;  %v1170_v42 = vadd.f32 %v1161_v45, %v1148_v39  ;;  %v1150_v43 = vpop.f32.mrb[3].mxu0  ;;  %v1275_v36 = vld [vmem:[#allocation2 + $0x8] sm:$0xf] }
 0x1c9   :  { %v1171_v48 = vadd.f32 %v1165_v46, %v1150_v43  ;;  %v1173_v49 = vmax.f32 %v1169_v38, 0.0  ;;  %v1270_v46 = vld [vmem:[#allocation2] sm:$0xff] }
 0x1ca   :  { %v1174_v17 = vmax.f32 %v1170_v42, 0.0  ;;  %v5057_v18 = vpack.c.bf16 %v1172_v41, %v1172_v41  ;;  %v1285_v42 = vld [vmem:[#allocation2 + $0xc] sm:$0x11] }
 0x1cb   :  { %v1175_v52 = vmax.f32 %v1171_v48, 0.0  ;;  %v5058_v58 = vpack.c.bf16 %v1173_v49, %v1173_v49 }
 0x1cc   :  { %1188 = vrot.lane.b32.xlu0 %v5057_v18, %s5840_s21  ;;  %v5059_v55 = vpack.c.bf16 %v1174_v17, %v1174_v17 }
 0x1cd   :  { %v5060_v60 = vpack.c.bf16 %v1175_v52, %v1175_v52 }
 0x1ce   :  { %1192 = vrot.lane.b32.xlu1 %v5059_v55, %s5840_s21  ;;  %v1293_v55 = vld [vmem:[#allocation2 + $0x18] sm:$0xff] }
 0x1d0   :  { %1190 = vrot.lane.b32.xlu0 %v5058_v58, %s5840_s21 }
 0x1d2   :  { %1194 = vrot.lane.b32.xlu1 %v5060_v60, %s5840_s21 }
 0x1d4   :  { %2507 = vperm.xlu0 %5341, %v2502_v9  }
 0x1d6   :  { %2516 = vperm.xlu1 %5342, %v2503_v12  }
 0x1d8   :  { %5344 = vset.pattern.permute.xlu0 %v5841_v13 }
 0x1d9   :  { %2563 = vperm.xlu0 %5344, %v2503_v12  }
 0x1da   :  { %5343 = vset.pattern.permute.xlu1 %v5841_v13 }
 0x1db   :  { %2555 = vperm.xlu1 %5343, %v2502_v9  }
 0x23e   :  { %v1189_v14 = vpop.permute.xlu0 %1188 }
 0x23f   :  { %v1202_v20 = vsel %vm1196_vm9, 0, %v1189_v14 }
 0x240   :  { %v1193_v10 = vpop.permute.xlu1 %1192 }
 0x241   :  { %v1204_v30 = vsel %vm1196_vm9, 0, %v1193_v10 }
 0x242   :  { %v1191_v19 = vpop.permute.xlu0 %1190 }
 0x243   :  { %v1197_v23 = vsel %vm1196_vm9, %v1189_v14, %v1191_v19  ;;  %v1206_v24 = vsel %vm1196_vm9, %v1191_v19, 0 }
 0x244   :  { %v4692_v26 = vcombine.low %v1202_v20, %v1197_v23  ;;  %v4693_v27 = vcombine.low %v1206_v24, %v1206_v24  ;;  %v1195_v28 = vpop.permute.xlu1 %1194 }
 0x245   :  { %v1198_v15 = vsel %vm1196_vm9, %v1193_v10, %v1195_v28  ;;  %v1208_v21 = vsel %vm1196_vm9, %v1195_v28, 0 }
 0x246   :  { %v1224_v31 = vshrl.u32 %v4692_v26, 16  ;;  %v1231_v45 = vshrl.u32 %v4693_v27, 16  ;;  %v4694_v33 = vcombine.low %v1204_v30, %v1198_v15  ;;  %v4695_v35 = vcombine.low %v1208_v21, %v1208_v21 }
 0x247   :  { %v1227_v39 = vshll.u32 %v4692_v26, 16  ;;  %v1234_v41 = vshll.u32 %v4693_v27, 16 }
 0x248   :  { %v1226_v38 = vrot.slane %v1224_v31, 7  ;;  %v1233_v40 = vrot.slane %v1231_v45, 7  ;;  %v1240_v48 = vshrl.u32 %v4694_v33, 16  ;;  %v1247_v49 = vshrl.u32 %v4695_v35, 16 }
 0x249   :  { %v1243_v58 = vshll.u32 %v4694_v33, 16  ;;  %v1250_v60 = vshll.u32 %v4695_v35, 16 }
 0x24a   :  { %v1229_v17 = vor.u32 %v1227_v39, %v1226_v38  ;;  %v1236_v18 = vor.u32 %v1234_v41, %v1233_v40  ;;  %v1237_v50 = vrot.slane %v1226_v38, 4  ;;  %v1238_v52 = vrot.slane %v1233_v40, 4 }
 0x24b   :  { %v1242_v57 = vrot.slane %v1240_v48, 7  ;;  %v1249_v59 = vrot.slane %v1247_v49, 7 }
 0x24c   :  { %v1271_v61 = vsel %vm1269_vm10, %v1229_v17, %v1270_v46  ;;  %v1276_v62 = vsel %vm6519_vm11, %v1236_v18, %v1275_v36  ;;  %v1286_v63 = vsel %vm6525_vm0, %v1237_v50, %v1285_v42  ;;  %v1291_v0 = vsel %vm6531_vm4, %v1238_v52, %v1290_v44 }
 0x24d   :  { %1272 = vst [vmem:[#allocation2] sm:$0xff] %v1271_v61  ;;  %1277 = vst [vmem:[#allocation2 + $0x8] sm:$0xf] %v1276_v62  ;;  %v1245_v5 = vor.u32 %v1243_v58, %v1242_v57  ;;  %v1252_v53 = vor.u32 %v1250_v60, %v1249_v59  ;;  %v1253_v54 = vrot.slane %v1242_v57, 4  ;;  %v1254_v56 = vrot.slane %v1249_v59, 4 }
 0x24e   :  { %1287 = vst [vmem:[#allocation2 + $0xc] sm:$0x11] %v1286_v63  ;;  %1292 = vst [vmem:[#allocation2 + $0x14] sm:$0x1] %v1291_v0 }
 0x24f   :  { %v1294_v8 = vsel %vm1269_vm10, %v1245_v5, %v1293_v55  ;;  %v1297_v9 = vsel %vm6519_vm11, %v1252_v53, %v1296_v2  ;;  %v1300_v12 = vsel %vm6525_vm0, %v1253_v54, %v1299_v3  ;;  %v1303_v13 = vsel %vm6531_vm4, %v1254_v56, %v1302_v4 }
 0x250   :  { %1295 = vst [vmem:[#allocation2 + $0x18] sm:$0xff] %v1294_v8  ;;  %1298 = vst [vmem:[#allocation2 + $0x20] sm:$0xf] %v1297_v9 }
 0x251   :  { %1301 = vst [vmem:[#allocation2 + $0x24] sm:$0x11] %v1300_v12  ;;  %1304 = vst [vmem:[#allocation2 + $0x2c] sm:$0x1] %v1303_v13 }
 0x254   :  { %v1305_v10 = vld [vmem:[#allocation2] sm:$0x11]  ;;  %v1308_v11 = vld [vmem:[#allocation2 + $0x8] sm:$0x1]  ;;  %v2084_v42 = vld [vmem:[#allocation2] sm:$0xee] }
 0x255   :  { %v1320_v19 = vld [vmem:[#allocation2 + $0xc] sm:$0x11]  ;;  %v1306_v20 = vsel %vm6525_vm0, 0, %v1305_v10  ;;  %v1309_v22 = vsel %vm6531_vm4, 0, %v1308_v11  ;;  %v1324_v24 = vld [vmem:[#allocation2 + $0x14] sm:$0x1] }
 0x256   :  { %v1321_v23 = vsel %vm1319_vm12, 0, %v1320_v19  ;;  %1307 = vst [vmem:[#allocation2] sm:$0x11] %v1306_v20  ;;  %1310 = vst [vmem:[#allocation2 + $0x8] sm:$0x1] %v1309_v22  ;;  %v1325_v25 = vsel %vm6575_vm14, 0, %v1324_v24 }
 0x257   :  { %1322 = vst [vmem:[#allocation2 + $0xc] sm:$0x11] %v1321_v23  ;;  %1326 = vst [vmem:[#allocation2 + $0x14] sm:$0x1] %v1325_v25  ;;  %v1311_v26 = vld [vmem:[#allocation2 + $0x18] sm:$0x11] }
 0x258   :  { %v1314_v27 = vld [vmem:[#allocation2 + $0x20] sm:$0x1]  ;;  %v1327_v28 = vld [vmem:[#allocation2 + $0x24] sm:$0x11]  ;;  %v1312_v15 = vsel %vm6525_vm0, 0, %v1311_v26  ;;  %v4825_v59 = vrot.slane %v2084_v42, 9 }
 0x259   :  { %v1315_v21 = vsel %vm6531_vm4, 0, %v1314_v27  ;;  %v1328_v30 = vsel %vm1319_vm12, 0, %v1327_v28  ;;  %v1330_v31 = vld [vmem:[#allocation2 + $0x2c] sm:$0x1]  ;;  %1313 = vst [vmem:[#allocation2 + $0x18] sm:$0x11] %v1312_v15 }
 0x25a   :  { %1316 = vst [vmem:[#allocation2 + $0x20] sm:$0x1] %v1315_v21  ;;  %1329 = vst [vmem:[#allocation2 + $0x24] sm:$0x11] %v1328_v30  ;;  %v1331_v45 = vsel %vm6575_vm14, 0, %v1330_v31 }
 0x25b   :  { %1332 = vst [vmem:[#allocation2 + $0x2c] sm:$0x1] %v1331_v45  ;;  %v2086_v43 = vld [vmem:[#allocation2 + $0x18] sm:$0xee]  ;;  %v2085_v17 = vld [vmem:[#allocation2 + $0x8] sm:$0xe] }
 0x25c   :  { %v4827_v60 = vrot.slane %v2086_v43, 9  ;;  %v2087_v0 = vld [vmem:[#allocation2 + $0x20] sm:$0xe]  ;;  %v4826_v2 = vrot.slane %v2085_v17, 9  ;;  %v5581_v27 = vld [vmem:[%s7455_s3 + $0x254] ss:$8 sps:$4 sm:$0xff]  }
 0x25d   :  { %v6601_v46 = vld [vmem:[#allocation2] sm:$0xff]  ;;  %v6615_v4 = vld [vmem:[#allocation2 + $0x8] sm:$0xf]  ;;  %v4828_v19 = vrot.slane %v2087_v0, 9  ;;  %v5579_v45 = vld [vmem:[%s7455_s3 + $0x250] ss:$8 sps:$4 sm:$0xff]   ;;  %v2517_v0 = vpop.permute.xlu1 %2516 }
 0x25e   :  { %v1384_v47 = vshrl.u32 %v6601_v46, 16  ;;  %v1387_v33 = vshll.u32 %v6601_v46, 16  ;;  %v1379_v35 = vld [vmem:[#allocation2 + $0xc] sm:$0x11]  ;;  %v6609_v57 = vld [vmem:[#allocation2 + $0x14] sm:$0x1] }
 0x25f   :  { %v1393_v48 = vshll.u32 %v1379_v35, 16  ;;  %v2098_v49 = vrot.slane %v1379_v35, 5  ;;  %v2102_v54 = vrot.slane %v6609_v57, 5  ;;  %v5576_v24 = vld [vmem:[%s7455_s3 + $0x240] ss:$8 sps:$4 sm:$0xff]   ;;  %v1398_v25 = vshrl.u32 %v6615_v4, 16 }
 0x260   :  { %v6605_v36 = vld [vmem:[#allocation2 + $0x18] sm:$0xff]  ;;  %v1386_v38 = vrot.slane %v1384_v47, 4  ;;  %v1389_v39 = vrot.slane %v1387_v33, 5  ;;  %v1401_v26 = vshll.u32 %v6615_v4, 16  ;;  %v5842_v35 = vmov 1966171168  }
 0x261   :  { %v1381_v37 = vld [vmem:[#allocation2 + $0x24] sm:$0x11]  ;;  %v1412_v40 = vshrl.u32 %v6605_v36, 16  ;;  %v1415_v41 = vshll.u32 %v6605_v36, 16  ;;  %v6611_v58 = vld [vmem:[#allocation2 + $0x20] sm:$0xf]  ;;  %v4781_v63 = vcombine.low %v6601_v46, %v6605_v36  ;;  %v6619_v53 = vsel %vm6116_vm6, %v4825_v59, %v2098_v49 }
 0x262   :  { %v1390_v44 = vor.u32 %v1389_v39, %v1386_v38  ;;  %v1421_v52 = vshll.u32 %v1381_v37, 16  ;;  %v2106_v55 = vrot.slane %v1381_v37, 5  ;;  %v1395_v3 = vrot.slane %v1393_v48, 5  ;;  %v1382_v5 = vld [vmem:[#allocation2 + $0x2c] sm:$0x1] }
 0x263   :  { %v1414_v18 = vrot.slane %v1412_v40, 4  ;;  %v1417_v50 = vrot.slane %v1415_v41, 5  ;;  %v4783_v7 = vcombine.low %v6615_v4, %v6611_v58  ;;  %v1426_v9 = vshrl.u32 %v6611_v58, 16  ;;  %v5584_v37 = vld [vmem:[%s7455_s3 + $0x264] ss:$8 sps:$4 sm:$0xff]  }
 0x264   :  { %v1391_v61 = vrot.slane %v1390_v44, 4  ;;  %v1423_v6 = vrot.slane %v1421_v52, 5  ;;  %v6626_v8 = vsel %vm6116_vm6, %v4827_v60, %v2106_v55  ;;  %v1429_v12 = vshll.u32 %v6611_v58, 16  ;;  %v5582_v39 = vld [vmem:[%s7455_s3 + $0x260] ss:$8 sps:$4 sm:$0xff]   ;;  %v2508_v60 = vpop.permute.xlu0 %2507 }
 0x265   :  { %v1418_v62 = vor.u32 %v1417_v50, %v1414_v18  ;;  %v4869_v13 = vcombine.low %v6619_v53, %v6626_v8  ;;  %v4870_v14 = vcombine.high %v6619_v53, %v6626_v8  ;;  %v2110_v20 = vrot.slane %v1382_v5, 5  ;;  %v5587_v43 = vld [vmem:[%s7455_s3 + $0x274] ss:$8 sps:$4 sm:$0xff]   ;;  %v5585_v49 = vld [vmem:[%s7455_s3 + $0x270] ss:$8 sps:$4 sm:$0xff]   ;;  %v5713_v8 = vld [vmem:[%s7459_s5 + $0xc0] sm:$0xff]  }
 0x266   :  { %v1396_v10 = vsel %vm5965_vm2, %v1391_v61, %v1395_v3  ;;  %v6648_v28 = vsel %vm6116_vm6, %v4826_v2, %v2102_v54  ;;  %v1428_v21 = vrot.slane %v1426_v9, 4  ;;  %v1431_v30 = vrot.slane %v1429_v12, 5  ;;  %v5590_v52 = vld [vmem:[%s7455_s3 + $0x4] ss:$8 sps:$4 sm:$0xff]   ;;  %v2504_v59 = vld [vmem:[%s7458_s6] sm:$0x3] }
 0x267   :  { %v1419_v56 = vrot.slane %v1418_v62, 4  ;;  %v6652_v15 = vsel %vm6116_vm6, %v4828_v19, %v2110_v20  ;;  %v1400_v47 = vrot.slane %v1398_v25, 4  ;;  %v1403_v33 = vrot.slane %v1401_v26, 5  ;;  %v5588_v62 = vld [vmem:[%s7455_s3] ss:$8 sps:$4 sm:$0xff]  }
 0x268   :  { %v4871_v31 = vcombine.low %v6648_v28, %v6652_v15  ;;  %v2529_v51 = vunpack.c.l.s4 %v5842_v35  ;;  %v1432_v38 = vor.u32 %v1431_v30, %v1428_v21  ;;  %v1435_v41 = vshll.u32 %v1382_v5, 16  ;;  %v5594_v3 = vld [vmem:[%s7455_s3 + $0x14] ss:$8 sps:$4 sm:$0xff]   ;;  %v5592_v20 = vld [vmem:[%s7455_s3 + $0x10] ss:$8 sps:$4 sm:$0xff]   ;;  %v5717_v15 = vld [vmem:[%s7459_s5 + $0xc8] sm:$0xff]  }
 0x269   :  { %v1424_v11 = vsel %vm5965_vm2, %v1419_v56, %v1423_v6  ;;  %v1404_v40 = vor.u32 %v1403_v33, %v1400_v47  ;;  %v1407_v44 = vshll.u32 %v6609_v57, 16  ;;  %v2526_v61 = vrot.slane %v2504_v59, %v6409_v29  ;;  %v5657_v58 = vld [vmem:[%s7455_s3 + $0x2a0] ss:$8 sps:$4 sm:$0xff]   ;;  %v5662_v4 = vld [vmem:[%s7455_s3 + $0x2b4] ss:$8 sps:$4 sm:$0xff]  }
 0x26a   :  { %v4737_v22 = vcombine.low %v1396_v10, %v1424_v11  ;;  %v4738_v23 = vcombine.high %v1396_v10, %v1424_v11  ;;  %v2530_v42 = vunpack.c.0.s8 %v2529_v51  ;;  %v1433_v48 = vrot.slane %v1432_v38, 4  ;;  %v5595_v51 = vld [vmem:[%s7455_s3 + $0x20] ss:$8 sps:$4 sm:$0xff]   ;;  %v5708_v53 = vld [vmem:[%s7455_s3 + $0x3b0] ss:$8 sps:$4 sm:$0xff]  }
 0x26b   :  { %v1405_v17 = vrot.slane %v1404_v40, 4  ;;  %v1437_v18 = vrot.slane %v1435_v41, 5  ;;  %v1409_v55 = vrot.slane %v1407_v44, 5  ;;  %v2573_v54 = vrot.slane %v2504_v59, %v6418_v32  ;;  %v5598_v44 = vld [vmem:[%s7455_s3 + $0x30] ss:$8 sps:$4 sm:$0xff]  }
 0x26c   :  { %1726 = vmatprep.mubr.bf16.mxu1 %v4738_v23  ;;  %v6674_v50 = vsub.s32 %v2530_v42, %v6403_v16  ;;  %v4782_v56 = vcombine.high %v6601_v46, %v6605_v36  ;;  %v2513_v6 = vrot.slane %v2508_v60, %v6409_v29  ;;  %v2522_v11 = vrot.slane %v2517_v0, %v6409_v29  ;;  %v2556_v23 = vpop.permute.xlu1 %2555  ;;  %v2638_v59 = vld [vmem:[%s7458_s6 + $0x18] sm:$0xff] }
 0x26d   :  { %1727 = vmatmul.mubr.bf16.vlgmr.msra.gmra.mrb[0].mxu1 %v4737_v22  ;;  %v1438_v57 = vsel %vm5965_vm2, %v1433_v48, %v1437_v18  ;;  %v1410_v16 = vsel %vm5965_vm2, %v1405_v17, %v1409_v55  ;;  %vm7486_vm2 = vcmask 523264   ;;  %v2564_v22 = vpop.permute.xlu0 %2563  ;;  %v2561_v47 = vrot.slane %v2556_v23, %v6409_v29  ;;  %v5601_v55 = vld [vmem:[%s7455_s3 + $0x40] ss:$8 sps:$4 sm:$0xff]   ;;  %v5606_v60 = vld [vmem:[%s7455_s3 + $0x54] ss:$8 sps:$4 sm:$0xff]  }
 0x26e   :  { %1738 = vmatpush1.bf16.msra.mxu1 %v5576_v24  ;;  %1769 = vmatprep.mubr.bf16.mxu1 %v5839_v1  ;;  %v4739_v2 = vcombine.low %v1410_v16, %v1438_v57  ;;  %v2534_v5 = vrot.slane %v2526_v61, %v6674_v50  ;;  %v2615_v9 = vrot.slane %v4919_v34, %v6674_v50  ;;  %v5597_v24 = vld [vmem:[%s7455_s3 + $0x24] ss:$8 sps:$4 sm:$0xff]   ;;  %v2637_v57 = vld [vmem:[%s7458_s6 + $0x10] sm:$0xff]  ;;  %v5843_v16 = vmov 0.0|0.0   ;;  %v5607_v34 = vld [vmem:[%s7455_s3 + $0x60] ss:$8 sps:$4 sm:$0xff]  }
 0x26f   :  { %1739 = vmatprep.subr.bf16.mxu1 %v5581_v27  ;;  %v2581_v19 = vrot.slane %v2573_v54, %v6674_v50  ;;  %v2569_v21 = vrot.slane %v2564_v22, %v6409_v29  ;;  %5282 = vmatprep.subr.bf16.mxu0 %v5843_v16  ;;  %vm5844_vm6 = vmmov 0   ;;  %v5624_v22 = vld [vmem:[%s7455_s3 + $0xb4] ss:$8 sps:$4 sm:$0xff]   ;;  %v5622_v23 = vld [vmem:[%s7455_s3 + $0xb0] ss:$8 sps:$4 sm:$0xff]   ;;  %vm7487_vm8 = vmmov %vm7486_vm2 }
 0x270   :  { %v2542_v12 = vrot.slane %v2534_v5, %v6674_v50  ;;  %v2535_v10 = vcombine.high %v2534_v5, %v2534_v5  ;;  %v2616_v27 = vcombine.high %v2615_v9, %v2615_v9  ;;  %v5845_v5 = vmov 0.0   ;;  %v5649_v46 = vld [vmem:[%s7455_s3 + $0x134] ss:$8 sps:$4 sm:$0xff]   ;;  %v5647_v36 = vld [vmem:[%s7455_s3 + $0x130] ss:$8 sps:$4 sm:$0xff]   ;;  %vm7488_vm11 = vmmov %vm7486_vm2 }
 0x271   :  { %v2582_v26 = vcombine.high %v2581_v19, %v2581_v19  ;;  %5256 = vmatprep.mubr.msk.f32.mxu0 %vm5844_vm6, %v5845_v5 }
 0x272   :  { %1740 = vmatpush1.bf16.msra.mxu1 %v5579_v45  ;;  %v2549_v25 = vrot.slane %v2535_v10, %v6674_v50  ;;  %v2552_v30 = vmul.f32 %v2542_v12, %v2513_v6  ;;  %v2589_v45 = vrot.slane %v2581_v19, %v6674_v50  ;;  %v2630_v40 = vrot.slane %v2616_v27, %v6674_v50  ;;  %v5610_v6 = vld [vmem:[%s7455_s3 + $0x70] ss:$8 sps:$4 sm:$0xff]   ;;  %v5613_v12 = vld [vmem:[%s7455_s3 + $0x80] ss:$8 sps:$4 sm:$0xff]   ;;  %v5618_v10 = vld [vmem:[%s7455_s3 + $0x94] ss:$8 sps:$4 sm:$0xff]  }
 0x273   :  { %1741 = vmatprep.subr.bf16.mxu1 %v5584_v37  ;;  %v2596_v35 = vrot.slane %v2582_v26, %v6674_v50  ;;  %v2623_v37 = vrot.slane %v2615_v9, %v6674_v50  ;;  %v5615_v9 = vld [vmem:[%s7455_s3 + $0x84] ss:$8 sps:$4 sm:$0xff]   ;;  %v5630_v26 = vld [vmem:[%s7455_s3 + $0xd4] ss:$8 sps:$4 sm:$0xff]   ;;  %v5628_v27 = vld [vmem:[%s7455_s3 + $0xd0] ss:$8 sps:$4 sm:$0xff]  }
 0x274   :  { %v2553_v33 = vmul.f32 %v2549_v25, %v2522_v11  ;;  %v2599_v38 = vmul.f32 %v2589_v45, %v2561_v47  ;;  %v5616_v11 = vld [vmem:[%s7455_s3 + $0x90] ss:$8 sps:$4 sm:$0xff]   ;;  %v5621_v19 = vld [vmem:[%s7455_s3 + $0xa4] ss:$8 sps:$4 sm:$0xff]   ;;  %v5625_v25 = vld [vmem:[%s7455_s3 + $0xc0] ss:$8 sps:$4 sm:$0xff]  }
 0x275   :  { %v2600_v41 = vmul.f32 %v2596_v35, %v2569_v21  ;;  %v5633_v21 = vld [vmem:[%s7455_s3 + $0xe4] ss:$8 sps:$4 sm:$0xff]   ;;  %v5636_v45 = vld [vmem:[%s7455_s3 + $0xf4] ss:$8 sps:$4 sm:$0xff]   ;;  %v5634_v47 = vld [vmem:[%s7455_s3 + $0xf0] ss:$8 sps:$4 sm:$0xff]  }
 0x276   :  { %1742 = vmatpush1.bf16.msra.mxu1 %v5582_v39  ;;  %v5600_v39 = vld [vmem:[%s7455_s3 + $0x34] ss:$8 sps:$4 sm:$0xff]   ;;  %v2601_v42 = vadd.f32 %v2599_v38, %v2552_v30  ;;  %v5631_v30 = vld [vmem:[%s7455_s3 + $0xe0] ss:$8 sps:$4 sm:$0xff]   ;;  %v5646_v38 = vld [vmem:[%s7455_s3 + $0x124] ss:$8 sps:$4 sm:$0xff]  }
 0x277   :  { %1743 = vmatprep.subr.bf16.mxu1 %v5587_v43  ;;  %v2602_v43 = vadd.f32 %v2600_v41, %v2553_v33  ;;  %v5640_v33 = vld [vmem:[%s7455_s3 + $0x104] ss:$8 sps:$4 sm:$0xff]   ;;  %v5638_v35 = vld [vmem:[%s7455_s3 + $0x100] ss:$8 sps:$4 sm:$0xff]   ;;  %v5656_v41 = vld [vmem:[%s7455_s3 + $0x294] ss:$8 sps:$4 sm:$0xff]  }
 0x278   :  { %v2633_v48 = vadd.f32 %v2623_v37, %v2601_v42  ;;  %v5641_v37 = vld [vmem:[%s7455_s3 + $0x110] ss:$8 sps:$4 sm:$0xff]  }
 0x279   :  { %v2634_v17 = vadd.f32 %v2630_v40, %v2602_v43  ;;  %v5651_v40 = vld [vmem:[%s7455_s3 + $0x280] ss:$8 sps:$4 sm:$0xff]   ;;  %v5654_v42 = vld [vmem:[%s7455_s3 + $0x290] ss:$8 sps:$4 sm:$0xff]   ;;  %v5659_v43 = vld [vmem:[%s7455_s3 + $0x2a4] ss:$8 sps:$4 sm:$0xff]  }
 0x27a   :  { %1744 = vmatpush1.bf16.msra.mxu1 %v5585_v49  ;;  %v5603_v49 = vld [vmem:[%s7455_s3 + $0x44] ss:$8 sps:$4 sm:$0xff]   ;;  %v2635_v18 = vmax.f32 %v2633_v48, 0.0  ;;  %v5668_v48 = vld [vmem:[%s7455_s3 + $0x2d4] ss:$8 sps:$4 sm:$0xff]  }
 0x27b   :  { %1998 = vmatprep.subr.bf16.mxu1 %v5590_v52  ;;  %v2636_v52 = vmax.f32 %v2634_v17, 0.0  ;;  %v5671_v17 = vld [vmem:[%s7455_s3 + $0x2e4] ss:$8 sps:$4 sm:$0xff]  }
 0x27d   :  { %4780 = vmatmul.mubr.msk.bf16.vlgmr.msra.gmra.mrb[0].mxu1 %vm7486_vm2, %v4739_v2  ;;  %v2646_v61 = vcombine.low %v2635_v18, %v2636_v52  ;;  %v5604_v2 = vld [vmem:[%s7455_s3 + $0x50] ss:$8 sps:$4 sm:$0xff]   ;;  %v5669_v18 = vld [vmem:[%s7455_s3 + $0x2e0] ss:$8 sps:$4 sm:$0xff]   ;;  %v5674_v52 = vld [vmem:[%s7455_s3 + $0x2f4] ss:$8 sps:$4 sm:$0xff]  }
 0x27e   :  { %1999 = vmatpush1.bf16.msra.mxu1 %v5588_v62  ;;  %2030 = vmatprep.mubr.bf16.mxu1 %v4782_v56  ;;  %v5283_v62 = vpack.c.bf16 %v2638_v59, %v2637_v57  ;;  %v5612_v56 = vld [vmem:[%s7455_s3 + $0x74] ss:$8 sps:$4 sm:$0xff]   ;;  %v5677_v57 = vld [vmem:[%s7455_s3 + $0x304] ss:$8 sps:$4 sm:$0xff]   ;;  %v5675_v59 = vld [vmem:[%s7455_s3 + $0x300] ss:$8 sps:$4 sm:$0xff]  }
 0x27f   :  { %2000 = vmatprep.subr.bf16.mxu1 %v5594_v3  ;;  %v2653_v0 = vrot.slane %v2646_v61, %v6674_v50  ;;  %v5609_v3 = vld [vmem:[%s7455_s3 + $0x64] ss:$8 sps:$4 sm:$0xff]  }
 0x280   :  { %5284 = vmatpush3.bf16.msra.mxu0 %v5283_v62  ;;  %v5711_v61 = vld [vmem:[%s7459_s5 + $0x40] sm:$0xff]  }
 0x281   :  { %v2660_v54 = vrot.slane %v2653_v0, %v6674_v50  ;;  %v5712_v62 = vld [vmem:[%s7459_s5] sm:$0xff]   ;;  %v5678_v0 = vld [vmem:[%s7455_s3 + $0x310] ss:$8 sps:$4 sm:$0xff]   ;;  %5068 = vmatprep.subr.bf16.mxu0 %v5711_v61 }
 0x282   :  { %2001 = vmatpush1.bf16.msra.mxu1 %v5592_v20  ;;  %v5619_v20 = vld [vmem:[%s7455_s3 + $0xa0] ss:$8 sps:$4 sm:$0xff]   ;;  %v5742_v61 = vld [vmem:[%s7459_s5 + $0xb8] sm:$0xff]  }
 0x283   :  { %2002 = vmatprep.subr.bf16.mxu1 %v5597_v24  ;;  %5257 = vmatmul.mubr.msk.f32.vlgmr.msra.gmra.mrb[4].mxu0 %vm2661_vm3, %v2660_v54  ;;  %v5627_v24 = vld [vmem:[%s7455_s3 + $0xc4] ss:$8 sps:$4 sm:$0xff]  }
 0x284   :  { %5069 = vmatpush3.bf16.msra.mxu0 %v5712_v62  ;;  %v5716_v54 = vld [vmem:[%s7459_s5 + $0x8] sm:$0xff]   ;;  %v5745_v62 = vld [vmem:[%s7459_s5 + $0x1c0] sm:$0xff]  }
 0x286   :  { %2003 = vmatpush1.bf16.msra.mxu1 %v5595_v51  ;;  %v5643_v51 = vld [vmem:[%s7455_s3 + $0x114] ss:$8 sps:$4 sm:$0xff]  }
 0x287   :  { %2004 = vmatprep.subr.bf16.mxu1 %v5600_v39  ;;  %v5644_v39 = vld [vmem:[%s7455_s3 + $0x120] ss:$8 sps:$4 sm:$0xff]  }
 0x28a   :  { %2005 = vmatpush1.bf16.msra.mxu1 %v5598_v44  ;;  %v5663_v44 = vld [vmem:[%s7455_s3 + $0x2c0] ss:$8 sps:$4 sm:$0xff]  }
 0x28b   :  { %2006 = vmatprep.subr.bf16.mxu1 %v5603_v49  ;;  %v5666_v49 = vld [vmem:[%s7455_s3 + $0x2d0] ss:$8 sps:$4 sm:$0xff]  }
 0x28e   :  { %2007 = vmatpush1.bf16.msra.mxu1 %v5601_v55  ;;  %v5672_v55 = vld [vmem:[%s7455_s3 + $0x2f0] ss:$8 sps:$4 sm:$0xff]  }
 0x28f   :  { %2008 = vmatprep.subr.bf16.mxu1 %v5606_v60  ;;  %v5680_v60 = vld [vmem:[%s7455_s3 + $0x314] ss:$8 sps:$4 sm:$0xff]  }
 0x292   :  { %2009 = vmatpush1.bf16.msra.mxu1 %v5604_v2  ;;  %v5683_v2 = vld [vmem:[%s7455_s3 + $0x324] ss:$8 sps:$4 sm:$0xff]  }
 0x293   :  { %2010 = vmatprep.subr.bf16.mxu1 %v5609_v3  ;;  %v5715_v3 = vld [vmem:[%s7459_s5 + $0x48] sm:$0xff]  }
 0x294   :  { %5070 = vmatprep.subr.bf16.mxu0 %v5715_v3 }
 0x295   :  { %5071 = vmatpush3.bf16.msra.mxu0 %v5716_v54 }
 0x296   :  { %2011 = vmatpush1.bf16.msra.mxu1 %v5607_v34  ;;  %v5681_v34 = vld [vmem:[%s7455_s3 + $0x320] ss:$8 sps:$4 sm:$0xff]  }
 0x297   :  { %2012 = vmatprep.subr.bf16.mxu1 %v5612_v56  ;;  %v5686_v56 = vld [vmem:[%s7455_s3 + $0x334] ss:$8 sps:$4 sm:$0xff]  }
 0x29a   :  { %2013 = vmatpush1.bf16.msra.mxu1 %v5610_v6  ;;  %v5684_v6 = vld [vmem:[%s7455_s3 + $0x330] ss:$8 sps:$4 sm:$0xff]  }
 0x29b   :  { %2014 = vmatprep.subr.bf16.mxu1 %v5615_v9  ;;  %v5689_v9 = vld [vmem:[%s7455_s3 + $0x344] ss:$8 sps:$4 sm:$0xff]  }
 0x29e   :  { %2015 = vmatpush1.bf16.msra.mxu1 %v5613_v12  ;;  %v5687_v12 = vld [vmem:[%s7455_s3 + $0x340] ss:$8 sps:$4 sm:$0xff]  }
 0x29f   :  { %2016 = vmatprep.subr.bf16.mxu1 %v5618_v10  ;;  %v5692_v10 = vld [vmem:[%s7455_s3 + $0x354] ss:$8 sps:$4 sm:$0xff]  }
 0x2a2   :  { %2017 = vmatpush1.bf16.msra.mxu1 %v5616_v11  ;;  %v5690_v11 = vld [vmem:[%s7455_s3 + $0x350] ss:$8 sps:$4 sm:$0xff]  }
 0x2a3   :  { %2018 = vmatprep.subr.bf16.mxu1 %v5621_v19  ;;  %v5695_v19 = vld [vmem:[%s7455_s3 + $0x364] ss:$8 sps:$4 sm:$0xff]  }
 0x2a6   :  { %2019 = vmatpush1.bf16.msra.mxu1 %v5619_v20  ;;  %v5693_v20 = vld [vmem:[%s7455_s3 + $0x360] ss:$8 sps:$4 sm:$0xff]  }
 0x2a7   :  { %2020 = vmatprep.subr.bf16.mxu1 %v5624_v22  ;;  %v5698_v22 = vld [vmem:[%s7455_s3 + $0x374] ss:$8 sps:$4 sm:$0xff]  }
 0x2aa   :  { %2021 = vmatpush1.bf16.msra.mxu1 %v5622_v23  ;;  %v5696_v23 = vld [vmem:[%s7455_s3 + $0x370] ss:$8 sps:$4 sm:$0xff]  }
 0x2ab   :  { %2022 = vmatprep.subr.bf16.mxu1 %v5627_v24  ;;  %v5701_v24 = vld [vmem:[%s7455_s3 + $0x384] ss:$8 sps:$4 sm:$0xff]  }
 0x2ae   :  { %2023 = vmatpush1.bf16.msra.mxu1 %v5625_v25  ;;  %v5699_v25 = vld [vmem:[%s7455_s3 + $0x380] ss:$8 sps:$4 sm:$0xff]  }
 0x2af   :  { %2024 = vmatprep.subr.bf16.mxu1 %v5630_v26  ;;  %v5704_v26 = vld [vmem:[%s7455_s3 + $0x394] ss:$8 sps:$4 sm:$0xff]  }
 0x2b2   :  { %2025 = vmatpush1.bf16.msra.mxu1 %v5628_v27  ;;  %v5702_v27 = vld [vmem:[%s7455_s3 + $0x390] ss:$8 sps:$4 sm:$0xff]  }
 0x2b3   :  { %2026 = vmatprep.subr.bf16.mxu1 %v5633_v21  ;;  %v5707_v21 = vld [vmem:[%s7455_s3 + $0x3a4] ss:$8 sps:$4 sm:$0xff]  }
 0x2b6   :  { %2027 = vmatpush1.bf16.msra.mxu1 %v5631_v30  ;;  %v5705_v30 = vld [vmem:[%s7455_s3 + $0x3a0] ss:$8 sps:$4 sm:$0xff]  }
 0x2b7   :  { %2028 = vmatprep.subr.bf16.mxu1 %v5636_v45  ;;  %v5710_v45 = vld [vmem:[%s7455_s3 + $0x3b4] ss:$8 sps:$4 sm:$0xff]  }
 0x2ba   :  { %2029 = vmatpush1.bf16.msra.mxu1 %v5634_v47 }
 0x2bb   :  { %2041 = vmatprep.subr.bf16.mxu1 %v5640_v33 }
 0x2bd   :  { %2031 = vmatmul.mubr.bf16.vlgmr.msra.gmra.mrb[0].mxu1 %v4781_v63  ;;  %v5653_v63 = vld [vmem:[%s7455_s3 + $0x284] ss:$8 sps:$4 sm:$0xff]  }
 0x2be   :  { %2042 = vmatpush1.bf16.msra.mxu1 %v5638_v35  ;;  %2073 = vmatprep.mubr.bf16.mxu1 %v5839_v1 }
 0x2bf   :  { %2043 = vmatprep.subr.bf16.mxu1 %v5643_v51  ;;  %v5714_v51 = vld [vmem:[%s7459_s5 + $0x80] sm:$0xff]  }
 0x2c2   :  { %2044 = vmatpush1.bf16.msra.mxu1 %v5641_v37  ;;  %v5719_v37 = vld [vmem:[%s7459_s5 + $0x50] sm:$0xff]  }
 0x2c3   :  { %2045 = vmatprep.subr.bf16.mxu1 %v5646_v38  ;;  %v5720_v38 = vld [vmem:[%s7459_s5 + $0x10] sm:$0xff]   ;;  %5072 = vmatprep.subr.bf16.mxu0 %v5719_v37  ;;  %v5744_v37 = vld [vmem:[%s7459_s5 + $0x100] sm:$0xff]  }
 0x2c4   :  { %5073 = vmatpush3.bf16.msra.mxu0 %v5720_v38 }
 0x2c6   :  { %2046 = vmatpush1.bf16.msra.mxu1 %v5644_v39  ;;  %v5721_v39 = vld [vmem:[%s7459_s5 + $0xd0] sm:$0xff]  }
 0x2c7   :  { %2047 = vmatprep.subr.bf16.mxu1 %v5649_v46  ;;  %v5722_v46 = vld [vmem:[%s7459_s5 + $0x90] sm:$0xff]  }
 0x2ca   :  { %2048 = vmatpush1.bf16.msra.mxu1 %v5647_v36  ;;  %v5723_v36 = vld [vmem:[%s7459_s5 + $0x58] sm:$0xff]  }
 0x2cb   :  { %2367 = vmatprep.subr.bf16.mxu1 %v5653_v63  ;;  %v5724_v63 = vld [vmem:[%s7459_s5 + $0x18] sm:$0xff]   ;;  %5074 = vmatprep.subr.bf16.mxu0 %v5723_v36  ;;  %v5746_v36 = vld [vmem:[%s7459_s5 + $0x180] sm:$0xff]  }
 0x2cc   :  { %5075 = vmatpush3.bf16.msra.mxu0 %v5724_v63  ;;  %v5747_v63 = vld [vmem:[%s7459_s5 + $0x148] sm:$0xff]  }
 0x2cd   :  { %4824 = vmatmul.mubr.msk.bf16.vlgmr.msra.gmra.mrb[0].mxu1 %vm7487_vm8, %v4783_v7  ;;  %v5660_v7 = vld [vmem:[%s7455_s3 + $0x2b0] ss:$8 sps:$4 sm:$0xff]  }
 0x2ce   :  { %2368 = vmatpush1.bf16.msra.mxu1 %v5651_v40  ;;  %2399 = vmatprep.mubr.bf16.mxu1 %v4870_v14  ;;  %v5665_v14 = vld [vmem:[%s7455_s3 + $0x2c4] ss:$8 sps:$4 sm:$0xff]   ;;  %v5725_v40 = vld [vmem:[%s7459_s5 + $0xd8] sm:$0xff]  }
 0x2cf   :  { %2369 = vmatprep.subr.bf16.mxu1 %v5656_v41  ;;  %v5726_v41 = vld [vmem:[%s7459_s5 + $0x98] sm:$0xff]  }
 0x2d2   :  { %2370 = vmatpush1.bf16.msra.mxu1 %v5654_v42  ;;  %v5727_v42 = vld [vmem:[%s7459_s5 + $0x60] sm:$0xff]  }
 0x2d3   :  { %2371 = vmatprep.subr.bf16.mxu1 %v5659_v43  ;;  %v5728_v43 = vld [vmem:[%s7459_s5 + $0x20] sm:$0xff]   ;;  %5076 = vmatprep.subr.bf16.mxu0 %v5727_v42 }
 0x2d4   :  { %5077 = vmatpush3.bf16.msra.mxu0 %v5728_v43  ;;  %v5748_v43 = vld [vmem:[%s7459_s5 + $0x108] sm:$0xff]  }
 0x2d6   :  { %2372 = vmatpush1.bf16.msra.mxu1 %v5657_v58  ;;  %v5729_v58 = vld [vmem:[%s7459_s5 + $0xe0] sm:$0xff]  }
 0x2d7   :  { %2373 = vmatprep.subr.bf16.mxu1 %v5662_v4  ;;  %v5730_v4 = vld [vmem:[%s7459_s5 + $0xa0] sm:$0xff]  }
 0x2da   :  { %2374 = vmatpush1.bf16.msra.mxu1 %v5660_v7  ;;  %v5731_v7 = vld [vmem:[%s7459_s5 + $0x68] sm:$0xff]  }
 0x2db   :  { %2375 = vmatprep.subr.bf16.mxu1 %v5665_v14  ;;  %v5732_v14 = vld [vmem:[%s7459_s5 + $0x28] sm:$0xff]   ;;  %5078 = vmatprep.subr.bf16.mxu0 %v5731_v7  ;;  %v5753_v7 = vld [vmem:[%s7459_s5 + $0x1d0] sm:$0xff]  }
 0x2dc   :  { %5079 = vmatpush3.bf16.msra.mxu0 %v5732_v14  ;;  %v5752_v14 = vld [vmem:[%s7459_s5 + $0x110] sm:$0xff]  }
 0x2de   :  { %2376 = vmatpush1.bf16.msra.mxu1 %v5663_v44  ;;  %v5733_v44 = vld [vmem:[%s7459_s5 + $0xe8] sm:$0xff]  }
 0x2df   :  { %2377 = vmatprep.subr.bf16.mxu1 %v5668_v48  ;;  %v5735_v48 = vld [vmem:[%s7459_s5 + $0x70] sm:$0xff]  }
 0x2e0   :  { %5080 = vmatprep.subr.bf16.mxu0 %v5735_v48  ;;  %v5754_v48 = vld [vmem:[%s7459_s5 + $0x190] sm:$0xff]  }
 0x2e2   :  { %2378 = vmatpush1.bf16.msra.mxu1 %v5666_v49  ;;  %v5734_v49 = vld [vmem:[%s7459_s5 + $0xa8] sm:$0xff]  }
 0x2e3   :  { %2379 = vmatprep.subr.bf16.mxu1 %v5671_v17  ;;  %v5737_v17 = vld [vmem:[%s7459_s5 + $0xf0] sm:$0xff]  }
 0x2e6   :  { %2380 = vmatpush1.bf16.msra.mxu1 %v5669_v18  ;;  %v5736_v18 = vld [vmem:[%s7459_s5 + $0x30] sm:$0xff]  }
 0x2e7   :  { %2381 = vmatprep.subr.bf16.mxu1 %v5674_v52  ;;  %v5739_v52 = vld [vmem:[%s7459_s5 + $0x78] sm:$0xff]   ;;  %5081 = vmatpush3.bf16.msra.mxu0 %v5736_v18  ;;  %v5759_v18 = vld [vmem:[%s7459_s5 + $0x160] sm:$0xff]  }
 0x2e8   :  { %5082 = vmatprep.subr.bf16.mxu0 %v5739_v52  ;;  %v5758_v52 = vld [vmem:[%s7459_s5 + $0x198] sm:$0xff]  }
 0x2ea   :  { %2382 = vmatpush1.bf16.msra.mxu1 %v5672_v55  ;;  %v5738_v55 = vld [vmem:[%s7459_s5 + $0xb0] sm:$0xff]  }
 0x2eb   :  { %2383 = vmatprep.subr.bf16.mxu1 %v5677_v57  ;;  %v5741_v57 = vld [vmem:[%s7459_s5 + $0xf8] sm:$0xff]  }
 0x2ee   :  { %2384 = vmatpush1.bf16.msra.mxu1 %v5675_v59  ;;  %v5740_v59 = vld [vmem:[%s7459_s5 + $0x38] sm:$0xff]  }
 0x2ef   :  { %2385 = vmatprep.subr.bf16.mxu1 %v5680_v60  ;;  %v5743_v60 = vld [vmem:[%s7459_s5 + $0x140] sm:$0xff]   ;;  %5083 = vmatpush3.bf16.msra.mxu0 %v5740_v59  ;;  %v5763_v59 = vld [vmem:[%s7459_s5 + $0x168] sm:$0xff]  }
 0x2f0   :  { %5112 = vmatprep.subr.bf16.mxu0 %v5743_v60  ;;  %v5762_v60 = vld [vmem:[%s7459_s5 + $0x1a0] sm:$0xff]  }
 0x2f2   :  { %2386 = vmatpush1.bf16.msra.mxu1 %v5678_v0  ;;  %v4696_v0 = vld [vmem:[%s7456_s4 + $0x1] ss:$2 sm:$0x3] }
 0x2f3   :  { %2387 = vmatprep.subr.bf16.mxu1 %v5683_v2  ;;  %v2461_v2 = vrot.slane %v4696_v0, %v6409_v29  ;;  %v2465_v3 = vrot.slane %v4696_v0, %v6418_v32  ;;  %v5767_v0 = vld [vmem:[%s7459_s5 + $0x170] sm:$0xff]  }
 0x2f6   :  { %2388 = vmatpush1.bf16.msra.mxu1 %v5681_v34 }
 0x2f7   :  { %2389 = vmatprep.subr.bf16.mxu1 %v5686_v56 }
 0x2fa   :  { %2390 = vmatpush1.bf16.msra.mxu1 %v5684_v6 }
 0x2fb   :  { %2391 = vmatprep.subr.bf16.mxu1 %v5689_v9 }
 0x2fe   :  { %2392 = vmatpush1.bf16.msra.mxu1 %v5687_v12 }
 0x2ff   :  { %2393 = vmatprep.subr.bf16.mxu1 %v5692_v10 }
 0x302   :  { %2394 = vmatpush1.bf16.msra.mxu1 %v5690_v11 }
 0x303   :  { %2395 = vmatprep.subr.bf16.mxu1 %v5695_v19 }
 0x306   :  { %2396 = vmatpush1.bf16.msra.mxu1 %v5693_v20 }
 0x307   :  { %2397 = vmatprep.subr.bf16.mxu1 %v5698_v22 }
 0x30a   :  { %2398 = vmatpush1.bf16.msra.mxu1 %v5696_v23 }
 0x30b   :  { %2410 = vmatprep.subr.bf16.mxu1 %v5701_v24 }
 0x30d   :  { %2400 = vmatmul.mubr.bf16.vlgmr.msra.gmra.mrb[0].mxu1 %v4869_v13  ;;  %v4920_v13 = vld [vmem:[%s7458_s6 + $0x20] ss:$0 sm:$0xff] }
 0x30e   :  { %2411 = vmatpush1.bf16.msra.mxu1 %v5699_v25  ;;  %2442 = vmatprep.mubr.bf16.mxu1 %v5839_v1  ;;  %v2991_v1 = vld [vmem:[%s7458_s6 + $0x28] sm:$0xff] }
 0x30f   :  { %2412 = vmatprep.subr.bf16.mxu1 %v5704_v26 }
 0x312   :  { %2413 = vmatpush1.bf16.msra.mxu1 %v5702_v27 }
 0x313   :  { %2414 = vmatprep.subr.bf16.mxu1 %v5707_v21 }
 0x316   :  { %2415 = vmatpush1.bf16.msra.mxu1 %v5705_v30 }
 0x317   :  { %2416 = vmatprep.subr.bf16.mxu1 %v5710_v45 }
 0x31a   :  { %2417 = vmatpush1.bf16.msra.mxu1 %v5708_v53 }
 0x31b   :  { %5259 = vmatprep.subr.mxu1 %v5845_v5 }
 0x31d   :  { %4912 = vmatmul.mubr.msk.bf16.vlgmr.msra.gmra.mrb[0].mxu1 %vm7488_vm11, %v4871_v31  ;;  %v5718_v31 = vld [vmem:[%s7459_s5 + $0x88] sm:$0xff]  }
 0x31e   :  { %5260 = vmatpush3.msra.mxu1 %v2991_v1  ;;  %5261 = vmatprep.mubr.msk.f32.mxu1 %vm5844_vm6, %v5845_v5 }
 0x31f   :  { %5090 = vmatprep.subr.bf16.mxu1 %v5713_v8 }
 0x356   :  { %v2730_v47 = vpop.f32.mrb[4].mxu0 }
 0x357   :  { %v2731_v33 = vadd.f32 %v4920_v13, %v2730_v47  ;;  %v5258_v35 = vpop.f32.mrb[5].mxu0 }
 0x359   :  { %v2734_v28 = vmax.f32 %v2731_v33, 0.0 }
 0x35b   :  { %5262 = vmatmul.mubr.msk.f32.vlgmr.msra.gmra.mrb[4].mxu1 %vm2992_vm15, %v2734_v28 }
 0x35c   :  { %5091 = vmatpush3.bf16.msra.mxu1 %v5714_v51 }
 0x35d   :  { %5092 = vmatprep.subr.bf16.mxu1 %v5717_v15 }
 0x360   :  { %5093 = vmatpush3.bf16.msra.mxu1 %v5718_v31 }
 0x361   :  { %5094 = vmatprep.subr.bf16.mxu1 %v5721_v39 }
 0x364   :  { %5095 = vmatpush3.bf16.msra.mxu1 %v5722_v46 }
 0x365   :  { %5096 = vmatprep.subr.bf16.mxu1 %v5725_v40 }
 0x368   :  { %5097 = vmatpush3.bf16.msra.mxu1 %v5726_v41  ;;  %v5749_v41 = vld [vmem:[%s7459_s5 + $0x1c8] sm:$0xff]  }
 0x369   :  { %5098 = vmatprep.subr.bf16.mxu1 %v5729_v58  ;;  %v5751_v58 = vld [vmem:[%s7459_s5 + $0x150] sm:$0xff]  }
 0x36c   :  { %5099 = vmatpush3.bf16.msra.mxu1 %v5730_v4  ;;  %v5750_v4 = vld [vmem:[%s7459_s5 + $0x188] sm:$0xff]  }
 0x36d   :  { %5100 = vmatprep.subr.bf16.mxu1 %v5733_v44  ;;  %v5755_v44 = vld [vmem:[%s7459_s5 + $0x158] sm:$0xff]  }
 0x370   :  { %5101 = vmatpush3.bf16.msra.mxu1 %v5734_v49  ;;  %v5757_v49 = vld [vmem:[%s7459_s5 + $0x1d8] sm:$0xff]  }
 0x371   :  { %5102 = vmatprep.subr.bf16.mxu1 %v5737_v17  ;;  %v5756_v17 = vld [vmem:[%s7459_s5 + $0x118] sm:$0xff]  }
 0x374   :  { %5103 = vmatpush3.bf16.msra.mxu1 %v5738_v55  ;;  %v5761_v55 = vld [vmem:[%s7459_s5 + $0x1e0] sm:$0xff]  }
 0x375   :  { %5104 = vmatprep.subr.bf16.mxu1 %v5741_v57  ;;  %v5760_v57 = vld [vmem:[%s7459_s5 + $0x120] sm:$0xff]  }
 0x378   :  { %5105 = vmatpush3.bf16.msra.mxu1 %v5742_v61  ;;  %v5765_v61 = vld [vmem:[%s7459_s5 + $0x1e8] sm:$0xff]  }
 0x379   :  { %5134 = vmatprep.subr.bf16.mxu1 %v5745_v62  ;;  %v5764_v62 = vld [vmem:[%s7459_s5 + $0x128] sm:$0xff]  }
 0x3f0   :  { %v2444_v54 = vpop.f32.mrb[0].mxu1 }
 0x3f1   :  { %v2468_v34 = vadd.f32 %v2461_v2, %v2444_v54  ;;  %v2446_v56 = vpop.f32.mrb[1].mxu1  ;;  %v5768_v54 = vld [vmem:[%s7459_s5 + $0x130] sm:$0xff]  }
 0x3f2   :  { %v2469_v6 = vadd.f32 %v2465_v3, %v2446_v56  ;;  %v2448_v9 = vpop.f32.mrb[2].mxu1  ;;  %v5771_v56 = vld [vmem:[%s7459_s5 + $0x178] sm:$0xff]  }
 0x3f3   :  { %v2472_v12 = vmax.f32 %v2468_v34, 0.0  ;;  %v2470_v10 = vadd.f32 %v2461_v2, %v2448_v9  ;;  %v2450_v11 = vpop.f32.mrb[3].mxu1  ;;  %v5766_v2 = vld [vmem:[%s7459_s5 + $0x1a8] sm:$0xff]   ;;  %v5773_v9 = vld [vmem:[%s7459_s5 + $0x1f8] sm:$0xff]  }
 0x3f4   :  { %v2473_v19 = vmax.f32 %v2469_v6, 0.0  ;;  %v2471_v20 = vadd.f32 %v2465_v3, %v2450_v11  ;;  %v5769_v3 = vld [vmem:[%s7459_s5 + $0x1f0] sm:$0xff]   ;;  %v5775_v11 = vld [vmem:[%s7459_s5 + $0x240] sm:$0xff]  }
 0x3f5   :  { %v2474_v22 = vmax.f32 %v2470_v10, 0.0  ;;  %v5770_v6 = vld [vmem:[%s7459_s5 + $0x1b0] sm:$0xff]  }
 0x3f6   :  { %v5061_v23 = vpack.c.bf16 %v2473_v19, %v2472_v12  ;;  %v2475_v24 = vmax.f32 %v2471_v20, 0.0  ;;  %v5772_v12 = vld [vmem:[%s7459_s5 + $0x138] sm:$0xff]  }
 0x3f7   :  { %v5774_v19 = vld [vmem:[%s7459_s5 + $0x1b8] sm:$0xff]  }
 0x3f8   :  { %v2487_v25 = vunpack.i.h.s16 %v5061_v23  ;;  %v5062_v26 = vpack.c.bf16 %v2475_v24, %v2474_v22  ;;  %v5777_v22 = vld [vmem:[%s7459_s5 + $0x2c0] sm:$0xff]  }
 0x3fa   :  { %v4915_v27 = vpack.c.b16 %v2487_v25, %v5061_v23  ;;  %v2495_v21 = vunpack.i.h.s16 %v5062_v26  ;;  %v5776_v23 = vld [vmem:[%s7459_s5 + $0x200] sm:$0xff]   ;;  %v5779_v25 = vld [vmem:[%s7459_s5 + $0x248] sm:$0xff]  }
 0x3fc   :  { %v2490_v29 = vunpack.i.h.s16 %v4915_v27  ;;  %v4917_v30 = vpack.c.b16 %v2495_v21, %v5062_v26  ;;  %v5778_v26 = vld [vmem:[%s7459_s5 + $0x280] sm:$0xff]   ;;  %v5781_v21 = vld [vmem:[%s7459_s5 + $0x2c8] sm:$0xff]  }
 0x3fe   :  { %v4916_v32 = vpack.c.b16 %v2490_v29, %v4915_v27  ;;  %v2498_v45 = vunpack.i.h.s16 %v4917_v30 }
 0x400   :  { %v4918_v53 = vpack.c.b16 %v2498_v45, %v4917_v30  ;;  %v2493_v1 = vunpack.i.h.s16 %v4916_v32  ;;  %v5780_v30 = vld [vmem:[%s7459_s5 + $0x208] sm:$0xff]  }
 0x401   :  { %v5782_v45 = vld [vmem:[%s7459_s5 + $0x288] sm:$0xff]  }
 0x402   :  { %v2501_v8 = vunpack.i.h.s16 %v4918_v53  ;;  %v4923_v13 = vpack.i.b16 %v4918_v53, %v4916_v32  ;;  %v5783_v32 = vld [vmem:[%s7459_s5 + $0x250] sm:$0xff]  }
 0x403   :  { %v5785_v53 = vld [vmem:[%s7459_s5 + $0x2d0] sm:$0xff]  }
 0x404   :  { %v3075_v47 = vrot.slane %v4923_v13, %v6674_v50  ;;  %v3068_v33 = vcombine.high %v4923_v13, %v4923_v13  ;;  %v7092_v35 = vpack.i.b16 %v2501_v8, %v2493_v1  ;;  %v5784_v1 = vld [vmem:[%s7459_s5 + $0x210] sm:$0xff]   ;;  %v5787_v8 = vld [vmem:[%s7459_s5 + $0x258] sm:$0xff]  }
 0x405   :  { %v5786_v13 = vld [vmem:[%s7459_s5 + $0x290] sm:$0xff]  }
 0x406   :  { %v3083_v51 = vcombine.high %v3075_v47, %v3075_v47  ;;  %v7095_v28 = vrot.slane %v3068_v33, %v6674_v50  ;;  %v3091_v15 = vrot.slane %v3075_v47, %v6674_v50  ;;  %v7179_v34 = vrot.slane %v7092_v35, %v6674_v50  ;;  %v5789_v47 = vld [vmem:[%s7459_s5 + $0x2d8] sm:$0xff]  }
 0x407   :  { %v5788_v33 = vld [vmem:[%s7459_s5 + $0x218] sm:$0xff]  }
 0x408   :  { %v3105_v31 = vrot.slane %v3083_v51, %v6674_v50  ;;  %v3084_v38 = vcombine.high %v7095_v28, %v7095_v28  ;;  %v3113_v40 = vcombine.high %v3091_v15, %v3091_v15  ;;  %v3132_v10 = vcombine.high %v7179_v34, %v7179_v34  ;;  %v5791_v51 = vld [vmem:[%s7459_s5 + $0x260] sm:$0xff]  }
 0x409   :  { %v3098_v20 = vrot.slane %v7095_v28, %v6674_v50  ;;  %v5790_v28 = vld [vmem:[%s7459_s5 + $0x298] sm:$0xff]  }
 0x40a   :  { %3982 = vmatprep.mubr.bf16.mxu0 %v3105_v31  ;;  %v3115_v39 = vcombine.high %v3105_v31, %v3105_v31  ;;  %v3112_v46 = vrot.slane %v3084_v38, %v6674_v50  ;;  %v3154_v24 = vrot.slane %v3132_v10, %v6674_v50  ;;  %v5792_v31 = vld [vmem:[%s7459_s5 + $0x220] sm:$0xff]   ;;  %v5820_v10 = vld [vmem:[%s7459_s5 + $0x318] sm:$0xff]  }
 0x40b   :  { %3983 = vmatmul.mubr.bf16.vlgmr.msra.gmra.mrb[8].mxu0 %v3091_v15  ;;  %v3114_v27 = vcombine.high %v3098_v20, %v3098_v20  ;;  %v5793_v15 = vld [vmem:[%s7459_s5 + $0x2e0] sm:$0xff]  }
 0x40c   :  { %5113 = vmatpush3.bf16.msra.mxu0 %v5744_v37  ;;  %4022 = vmatprep.mubr.bf16.mxu1 %v3115_v39  ;;  %v3116_v42 = vcombine.high %v3112_v46, %v3112_v46  ;;  %v3164_v29 = vcombine.high %v3154_v24, %v3154_v24  ;;  %v5795_v37 = vld [vmem:[%s7459_s5 + $0x268] sm:$0xff]   ;;  %v5794_v38 = vld [vmem:[%s7459_s5 + $0x2a0] sm:$0xff]  }
 0x40d   :  { %4062 = vmatprep.mubr.bf16.mxu0 %v3112_v46  ;;  %4023 = vmatmul.mubr.bf16.vlgmr.msra.gmra.mrb[8].mxu1 %v3113_v40  ;;  %v5797_v39 = vld [vmem:[%s7459_s5 + $0x2e8] sm:$0xff]   ;;  %v5799_v40 = vld [vmem:[%s7459_s5 + $0x270] sm:$0xff]  }
 0x40e   :  { %5135 = vmatpush3.bf16.msra.mxu1 %v5746_v36  ;;  %5114 = vmatprep.subr.bf16.mxu0 %v5747_v63  ;;  %v5796_v46 = vld [vmem:[%s7459_s5 + $0x228] sm:$0xff]   ;;  %v3117_v36 = vcombine.high %v7092_v35, %v7092_v35  ;;  %v5800_v35 = vld [vmem:[%s7459_s5 + $0x230] sm:$0xff]  }
 0x40f   :  { %4102 = vmatprep.mubr.bf16.mxu1 %v3116_v42  ;;  %5136 = vmatprep.subr.bf16.mxu1 %v5749_v41  ;;  %v5798_v42 = vld [vmem:[%s7459_s5 + $0x2a8] sm:$0xff]  }
 0x410   :  { %5115 = vmatpush3.bf16.msra.mxu0 %v5748_v43  ;;  %v5801_v43 = vld [vmem:[%s7459_s5 + $0x2f0] sm:$0xff]  }
 0x411   :  { %5116 = vmatprep.subr.bf16.mxu0 %v5751_v58  ;;  %v7287_v58 = vrot.slane %v3117_v36, %v6674_v50 }
 0x412   :  { %5137 = vmatpush3.bf16.msra.mxu1 %v5750_v4  ;;  %v5803_v4 = vld [vmem:[%s7459_s5 + $0x278] sm:$0xff]  }
 0x413   :  { %5138 = vmatprep.subr.bf16.mxu1 %v5753_v7  ;;  %v5802_v7 = vld [vmem:[%s7459_s5 + $0x2b0] sm:$0xff]  }
 0x414   :  { %5117 = vmatpush3.bf16.msra.mxu0 %v5752_v14  ;;  %v5805_v14 = vld [vmem:[%s7459_s5 + $0x2f8] sm:$0xff]  }
 0x415   :  { %5118 = vmatprep.subr.bf16.mxu0 %v5755_v44  ;;  %v5804_v44 = vld [vmem:[%s7459_s5 + $0x238] sm:$0xff]  }
 0x416   :  { %5139 = vmatpush3.bf16.msra.mxu1 %v5754_v48  ;;  %v3133_v48 = vcombine.high %v7287_v58, %v7287_v58 }
 0x417   :  { %5140 = vmatprep.subr.bf16.mxu1 %v5757_v49  ;;  %v5807_v49 = vld [vmem:[%s7459_s5 + $0x340] sm:$0xff]  }
 0x418   :  { %5119 = vmatpush3.bf16.msra.mxu0 %v5756_v17  ;;  %v5806_v17 = vld [vmem:[%s7459_s5 + $0x2b8] sm:$0xff]  }
 0x419   :  { %5120 = vmatprep.subr.bf16.mxu0 %v5759_v18  ;;  %v3140_v18 = vrot.slane %v7179_v34, %v6674_v50  ;;  %v5817_v34 = vld [vmem:[%s7459_s5 + $0x3d0] sm:$0xff]  }
 0x41a   :  { %5141 = vmatpush3.bf16.msra.mxu1 %v5758_v52  ;;  %v5809_v52 = vld [vmem:[%s7459_s5 + $0x3c0] sm:$0xff]  }
 0x41b   :  { %5142 = vmatprep.subr.bf16.mxu1 %v5761_v55  ;;  %v5808_v55 = vld [vmem:[%s7459_s5 + $0x300] sm:$0xff]  }
 0x41c   :  { %5121 = vmatpush3.bf16.msra.mxu0 %v5760_v57  ;;  %v3161_v57 = vrot.slane %v3133_v48, %v6674_v50 }
 0x41d   :  { %5122 = vmatprep.subr.bf16.mxu0 %v5763_v59  ;;  %v5811_v59 = vld [vmem:[%s7459_s5 + $0x348] sm:$0xff]  }
 0x41e   :  { %5143 = vmatpush3.bf16.msra.mxu1 %v5762_v60  ;;  %v5810_v60 = vld [vmem:[%s7459_s5 + $0x380] sm:$0xff]  }
 0x41f   :  { %5144 = vmatprep.subr.bf16.mxu1 %v5765_v61  ;;  %v3162_v61 = vcombine.high %v3140_v18, %v3140_v18 }
 0x420   :  { %5123 = vmatpush3.bf16.msra.mxu0 %v5764_v62  ;;  %v5813_v62 = vld [vmem:[%s7459_s5 + $0x3c8] sm:$0xff]  }
 0x421   :  { %5124 = vmatprep.subr.bf16.mxu0 %v5767_v0  ;;  %v3165_v0 = vcombine.high %v3161_v57, %v3161_v57 }
 0x422   :  { %5145 = vmatpush3.bf16.msra.mxu1 %v5766_v2  ;;  %v5812_v2 = vld [vmem:[%s7459_s5 + $0x308] sm:$0xff]  }
 0x423   :  { %5146 = vmatprep.subr.bf16.mxu1 %v5769_v3  ;;  %v5815_v3 = vld [vmem:[%s7459_s5 + $0x350] sm:$0xff]  }
 0x424   :  { %5125 = vmatpush3.bf16.msra.mxu0 %v5768_v54  ;;  %v5814_v54 = vld [vmem:[%s7459_s5 + $0x388] sm:$0xff]  }
 0x425   :  { %5126 = vmatprep.subr.bf16.mxu0 %v5771_v56  ;;  %v5816_v56 = vld [vmem:[%s7459_s5 + $0x310] sm:$0xff]  }
 0x426   :  { %5147 = vmatpush3.bf16.msra.mxu1 %v5770_v6  ;;  %v5819_v6 = vld [vmem:[%s7459_s5 + $0x358] sm:$0xff]  }
 0x427   :  { %5148 = vmatprep.subr.bf16.mxu1 %v5773_v9  ;;  %v5818_v9 = vld [vmem:[%s7459_s5 + $0x390] sm:$0xff]  }
 0x428   :  { %5127 = vmatpush3.bf16.msra.mxu0 %v5772_v12  ;;  %v5821_v12 = vld [vmem:[%s7459_s5 + $0x3d8] sm:$0xff]  }
 0x429   :  { %5156 = vmatprep.subr.bf16.mxu0 %v5775_v11  ;;  %v5823_v11 = vld [vmem:[%s7459_s5 + $0x360] sm:$0xff]  }
 0x42a   :  { %5149 = vmatpush3.bf16.msra.mxu1 %v5774_v19  ;;  %v5822_v19 = vld [vmem:[%s7459_s5 + $0x398] sm:$0xff]  }
 0x42b   :  { %4063 = vmatmul.mubr.bf16.vlgmr.msra.gmra.mrb[12].mxu0 %v3098_v20  ;;  %5178 = vmatprep.subr.bf16.mxu1 %v5777_v22  ;;  %v5825_v20 = vld [vmem:[%s7459_s5 + $0x3e0] sm:$0xff]  }
 0x42c   :  { %5157 = vmatpush3.bf16.msra.mxu0 %v5776_v23  ;;  %4142 = vmatprep.mubr.bf16.mxu0 %v3154_v24  ;;  %v5824_v22 = vld [vmem:[%s7459_s5 + $0x320] sm:$0xff]   ;;  %v5827_v23 = vld [vmem:[%s7459_s5 + $0x368] sm:$0xff]  }
 0x42d   :  { %4103 = vmatmul.mubr.bf16.vlgmr.msra.gmra.mrb[12].mxu1 %v3114_v27  ;;  %5158 = vmatprep.subr.bf16.mxu0 %v5779_v25  ;;  %v5826_v24 = vld [vmem:[%s7459_s5 + $0x3a0] sm:$0xff]   ;;  %v5829_v25 = vld [vmem:[%s7459_s5 + $0x3e8] sm:$0xff]   ;;  %v5831_v27 = vld [vmem:[%s7459_s5 + $0x370] sm:$0xff]  }
 0x42e   :  { %5179 = vmatpush3.bf16.msra.mxu1 %v5778_v26  ;;  %4182 = vmatprep.mubr.bf16.mxu1 %v3164_v29  ;;  %v7272_v63 = vpop.f32.mrb[4].mxu1  ;;  %v5828_v26 = vld [vmem:[%s7459_s5 + $0x328] sm:$0xff]   ;;  %v5833_v29 = vld [vmem:[%s7459_s5 + $0x3f0] sm:$0xff]  }
 0x42f   :  { %5180 = vmatprep.subr.bf16.mxu1 %v5781_v21  ;;  %v5263_v41 = vpop.f32.mrb[5].mxu1  ;;  %v5830_v21 = vld [vmem:[%s7459_s5 + $0x3a8] sm:$0xff]  }
 0x430   :  { %5159 = vmatpush3.bf16.msra.mxu0 %v5780_v30  ;;  %v5832_v30 = vld [vmem:[%s7459_s5 + $0x330] sm:$0xff]  }
 0x431   :  { %5160 = vmatprep.subr.bf16.mxu0 %v5783_v32  ;;  %v5835_v32 = vld [vmem:[%s7459_s5 + $0x378] sm:$0xff]  }
 0x432   :  { %5181 = vmatpush3.bf16.msra.mxu1 %v5782_v45  ;;  %v5834_v45 = vld [vmem:[%s7459_s5 + $0x3b0] sm:$0xff]  }
 0x433   :  { %5182 = vmatprep.subr.bf16.mxu1 %v5785_v53  ;;  %v5837_v53 = vld [vmem:[%s7459_s5 + $0x3f8] sm:$0xff]  }
 0x434   :  { %5161 = vmatpush3.bf16.msra.mxu0 %v5784_v1  ;;  %v5836_v1 = vld [vmem:[%s7459_s5 + $0x338] sm:$0xff]  }
 0x435   :  { %5162 = vmatprep.subr.bf16.mxu0 %v5787_v8  ;;  %v5838_v8 = vld [vmem:[%s7459_s5 + $0x3b8] sm:$0xff]  }
 0x436   :  { %5183 = vmatpush3.bf16.msra.mxu1 %v5786_v13  ;;  %v3147_v13 = vrot.slane %v7287_v58, %v6674_v50 }
 0x437   :  { %5184 = vmatprep.subr.bf16.mxu1 %v5789_v47 }
 0x438   :  { %5163 = vmatpush3.bf16.msra.mxu0 %v5788_v33  ;;  %v3163_v47 = vcombine.high %v3147_v13, %v3147_v13  ;;  %v4277_v33 = vld [vmem:[%s7458_s6 + $0x38] sm:$0xff] }
 0x439   :  { %5164 = vmatprep.subr.bf16.mxu0 %v5791_v51  ;;  %v4278_v51 = vld [vmem:[%s7458_s6 + $0x40] sm:$0xff] }
 0x43a   :  { %5185 = vmatpush3.bf16.msra.mxu1 %v5790_v28  ;;  %v5286_v28 = vpack.c.bf16 %v4278_v51, %v4277_v33 }
 0x43b   :  { %5186 = vmatprep.subr.bf16.mxu1 %v5793_v15  ;;  %v4279_v15 = vld [vmem:[%s7458_s6 + $0x48] sm:$0xff] }
 0x43c   :  { %5165 = vmatpush3.bf16.msra.mxu0 %v5792_v31  ;;  %v4280_v31 = vld [vmem:[%s7458_s6 + $0x50] sm:$0xff] }
 0x43d   :  { %5166 = vmatprep.subr.bf16.mxu0 %v5795_v37  ;;  %v5289_v37 = vpack.c.bf16 %v4280_v31, %v4279_v15 }
 0x43e   :  { %5187 = vmatpush3.bf16.msra.mxu1 %v5794_v38  ;;  %v4361_v38 = vld [vmem:[%s7458_s6 + $0x68] sm:$0xff] }
 0x43f   :  { %5188 = vmatprep.subr.bf16.mxu1 %v5797_v39 }
 0x440   :  { %5167 = vmatpush3.bf16.msra.mxu0 %v5796_v46 }
 0x441   :  { %5168 = vmatprep.subr.bf16.mxu0 %v5799_v40 }
 0x442   :  { %5189 = vmatpush3.bf16.msra.mxu1 %v5798_v42 }
 0x443   :  { %5190 = vmatprep.subr.bf16.mxu1 %v5801_v43 }
 0x444   :  { %5169 = vmatpush3.bf16.msra.mxu0 %v5800_v35 }
 0x445   :  { %5170 = vmatprep.subr.bf16.mxu0 %v5803_v4 }
 0x446   :  { %5191 = vmatpush3.bf16.msra.mxu1 %v5802_v7 }
 0x447   :  { %5192 = vmatprep.subr.bf16.mxu1 %v5805_v14 }
 0x448   :  { %5171 = vmatpush3.bf16.msra.mxu0 %v5804_v44 }
 0x449   :  { %5200 = vmatprep.subr.bf16.mxu0 %v5807_v49 }
 0x44a   :  { %5193 = vmatpush3.bf16.msra.mxu1 %v5806_v17 }
 0x44b   :  { %4143 = vmatmul.mubr.bf16.vlgmr.msra.gmra.mrb[16].mxu0 %v3140_v18  ;;  %5222 = vmatprep.subr.bf16.mxu1 %v5809_v52 }
 0x44c   :  { %5201 = vmatpush3.bf16.msra.mxu0 %v5808_v55  ;;  %4222 = vmatprep.mubr.bf16.mxu0 %v3161_v57 }
 0x44d   :  { %4183 = vmatmul.mubr.bf16.vlgmr.msra.gmra.mrb[16].mxu1 %v3162_v61  ;;  %5202 = vmatprep.subr.bf16.mxu0 %v5811_v59 }
 0x44e   :  { %5223 = vmatpush3.bf16.msra.mxu1 %v5810_v60  ;;  %4262 = vmatprep.mubr.bf16.mxu1 %v3165_v0 }
 0x44f   :  { %5224 = vmatprep.subr.bf16.mxu1 %v5813_v62 }
 0x450   :  { %5203 = vmatpush3.bf16.msra.mxu0 %v5812_v2 }
 0x451   :  { %5204 = vmatprep.subr.bf16.mxu0 %v5815_v3 }
 0x452   :  { %5225 = vmatpush3.bf16.msra.mxu1 %v5814_v54 }
 0x453   :  { %5226 = vmatprep.subr.bf16.mxu1 %v5817_v34 }
 0x454   :  { %5205 = vmatpush3.bf16.msra.mxu0 %v5816_v56 }
 0x455   :  { %5206 = vmatprep.subr.bf16.mxu0 %v5819_v6 }
 0x456   :  { %5227 = vmatpush3.bf16.msra.mxu1 %v5818_v9 }
 0x457   :  { %5228 = vmatprep.subr.bf16.mxu1 %v5821_v12 }
 0x458   :  { %5207 = vmatpush3.bf16.msra.mxu0 %v5820_v10 }
 0x459   :  { %5208 = vmatprep.subr.bf16.mxu0 %v5823_v11 }
 0x45a   :  { %5229 = vmatpush3.bf16.msra.mxu1 %v5822_v19 }
 0x45b   :  { %5230 = vmatprep.subr.bf16.mxu1 %v5825_v20 }
 0x45c   :  { %5209 = vmatpush3.bf16.msra.mxu0 %v5824_v22 }
 0x45d   :  { %5210 = vmatprep.subr.bf16.mxu0 %v5827_v23 }
 0x45e   :  { %5231 = vmatpush3.bf16.msra.mxu1 %v5826_v24 }
 0x45f   :  { %5232 = vmatprep.subr.bf16.mxu1 %v5829_v25 }
 0x460   :  { %5211 = vmatpush3.bf16.msra.mxu0 %v5828_v26 }
 0x461   :  { %5212 = vmatprep.subr.bf16.mxu0 %v5831_v27 }
 0x462   :  { %5233 = vmatpush3.bf16.msra.mxu1 %v5830_v21 }
 0x463   :  { %5234 = vmatprep.subr.bf16.mxu1 %v5833_v29 }
 0x464   :  { %5213 = vmatpush3.bf16.msra.mxu0 %v5832_v30  ;;  %v5052_v30 = vld [vmem:[%s7458_s6 + $0x30] ss:$0 sm:$0xff] }
 0x465   :  { %5214 = vmatprep.subr.bf16.mxu0 %v5835_v32 }
 0x466   :  { %5235 = vmatpush3.bf16.msra.mxu1 %v5834_v45 }
 0x467   :  { %5236 = vmatprep.subr.bf16.mxu1 %v5837_v53 }
 0x468   :  { %5215 = vmatpush3.bf16.msra.mxu0 %v5836_v1 }
 0x469   :  { %5285 = vmatprep.subr.bf16.mxu0 %v5843_v16 }
 0x46a   :  { %5237 = vmatpush3.bf16.msra.mxu1 %v5838_v8  ;;  %v5053_v8 = vld [vmem:[%s7458_s6 + $0x58] ss:$0 sm:$0xff] }
 0x46b   :  { %4223 = vmatmul.mubr.bf16.vlgmr.msra.gmra.mrb[20].mxu0 %v3147_v13  ;;  %5291 = vmatprep.subr.bf16.mxu1 %v5843_v16 }
 0x46c   :  { %5272 = vmatprep.mubr.msk.f32.mxu0 %vm5844_vm6, %v5845_v5  ;;  %5287 = vmatpush3.bf16.msra.mxu0 %v5286_v28  ;;  %v5055_v28 = vld [vmem:[%s7458_s6 + $0x70] ss:$0 sm:$0xff] }
 0x46d   :  { %4263 = vmatmul.mubr.bf16.vlgmr.msra.gmra.mrb[20].mxu1 %v3163_v47  ;;  %5288 = vmatprep.subr.bf16.mxu0 %v5843_v16 }
 0x46e   :  { %5279 = vmatprep.mubr.msk.f32.mxu1 %vm5844_vm6, %v5845_v5  ;;  %v4360_v5 = vld [vmem:[%s7458_s6 + $0x60] sm:$0xff] }
 0x46f   :  { %v5292_v39 = vpack.c.bf16 %v4361_v38, %v4360_v5 }
 0x470   :  { %5290 = vmatpush3.bf16.msra.mxu0 %v5289_v37 }
 0x471   :  { %5293 = vmatpush3.bf16.msra.mxu1 %v5292_v39 }
 0x4de   :  { %v5084_v46 = vpop.f32.mrb[8].mxu0 }
 0x4df   :  { %v5085_v36 = vpop.f32.mrb[9].mxu0 }
 0x4e0   :  { %v5086_v40 = vadd.f32 %v5085_v36, %v5084_v46  ;;  %v5087_v41 = vpop.f32.mrb[10].mxu0  ;;  %v5106_v42 = vpop.f32.mrb[8].mxu1 }
 0x4e1   :  { %v5088_v43 = vpop.f32.mrb[11].mxu0  ;;  %v5107_v35 = vpop.f32.mrb[9].mxu1 }
 0x4e2   :  { %v3985_v16 = vadd.f32 %v5086_v40, %v7272_v63  ;;  %v5108_v58 = vadd.f32 %v5107_v35, %v5106_v42  ;;  %v5109_v4 = vpop.f32.mrb[10].mxu1 }
 0x4e3   :  { %v5110_v7 = vpop.f32.mrb[11].mxu1 }
 0x4e4   :  { %v4025_v14 = vadd.f32 %v5108_v58, %v3985_v16 }
 0x4fe   :  { %v5128_v44 = vpop.f32.mrb[12].mxu0 }
 0x4ff   :  { %v5129_v48 = vpop.f32.mrb[13].mxu0 }
 0x500   :  { %v5130_v49 = vadd.f32 %v5129_v48, %v5128_v44  ;;  %v5131_v17 = vpop.f32.mrb[14].mxu0  ;;  %v5150_v18 = vpop.f32.mrb[12].mxu1 }
 0x501   :  { %v5132_v52 = vpop.f32.mrb[15].mxu0  ;;  %v5151_v55 = vpop.f32.mrb[13].mxu1 }
 0x502   :  { %v4065_v57 = vadd.f32 %v5130_v49, %v4025_v14  ;;  %v5152_v59 = vadd.f32 %v5151_v55, %v5150_v18  ;;  %v5153_v60 = vpop.f32.mrb[14].mxu1 }
 0x503   :  { %v5154_v61 = vpop.f32.mrb[15].mxu1 }
 0x504   :  { %v4105_v62 = vadd.f32 %v5152_v59, %v4065_v57 }
 0x51e   :  { %v5172_v0 = vpop.f32.mrb[16].mxu0 }
 0x51f   :  { %v5173_v2 = vpop.f32.mrb[17].mxu0 }
 0x520   :  { %v5174_v3 = vadd.f32 %v5173_v2, %v5172_v0  ;;  %v5175_v63 = vpop.f32.mrb[18].mxu0  ;;  %v5194_v54 = vpop.f32.mrb[16].mxu1 }
 0x521   :  { %v5176_v34 = vpop.f32.mrb[19].mxu0  ;;  %v5195_v56 = vpop.f32.mrb[17].mxu1 }
 0x522   :  { %v4145_v6 = vadd.f32 %v5174_v3, %v4105_v62  ;;  %v5196_v9 = vadd.f32 %v5195_v56, %v5194_v54  ;;  %v5197_v12 = vpop.f32.mrb[18].mxu1 }
 0x523   :  { %v5198_v10 = vpop.f32.mrb[19].mxu1 }
 0x524   :  { %v4185_v11 = vadd.f32 %v5196_v9, %v4145_v6 }
 0x53e   :  { %v5216_v19 = vpop.f32.mrb[20].mxu0 }
 0x53f   :  { %v5217_v20 = vpop.f32.mrb[21].mxu0 }
 0x540   :  { %v5218_v22 = vadd.f32 %v5217_v20, %v5216_v19  ;;  %v5219_v23 = vpop.f32.mrb[22].mxu0  ;;  %v5238_v24 = vpop.f32.mrb[20].mxu1 }
 0x541   :  { %v5220_v25 = vpop.f32.mrb[23].mxu0  ;;  %v5239_v26 = vpop.f32.mrb[21].mxu1 }
 0x542   :  { %v4225_v27 = vadd.f32 %v5218_v22, %v4185_v11  ;;  %v5240_v21 = vadd.f32 %v5239_v26, %v5238_v24  ;;  %v5241_v29 = vpop.f32.mrb[22].mxu1 }
 0x543   :  { %v5242_v32 = vpop.f32.mrb[23].mxu1 }
 0x544   :  { %v4265_v45 = vadd.f32 %v5240_v21, %v4225_v27 }
 0x546   :  { %v4275_v53 = vadd.f32 %v5052_v30, %v4265_v45 }
 0x548   :  { %v4276_v1 = vmax.f32 %v4275_v53, 0.0 }
 0x54a   :  { %5273 = vmatmul.mubr.msk.f32.vlgmr.msra.gmra.mrb[6].mxu0 %vm1196_vm9, %v4276_v1  ;;  %vm4465_vm9 = vcmask 0  }
 0x61d   :  { %v4355_v13 = vpop.f32.mrb[6].mxu0 }
 0x61e   :  { %v4356_v47 = vadd.f32 %v5053_v8, %v4355_v13  ;;  %v5274_v33 = vpop.f32.mrb[7].mxu0 }
 0x620   :  { %v4359_v51 = vmax.f32 %v4356_v47, 0.0 }
 0x622   :  { %5280 = vmatmul.mubr.msk.f32.vlgmr.msra.gmra.mrb[6].mxu1 %vm2661_vm3, %v4359_v51 }
 0x6f5   :  { %v4436_v15 = vpop.f32.mrb[6].mxu1 }
 0x6f6   :  { %v4437_v31 = vadd.f32 %v5055_v28, %v4436_v15  ;;  %v5281_v37 = vpop.f32.mrb[7].mxu1 }
 0x6f8   :  { %v4447_v5 = vrot.slane %v4437_v31, %v6674_v50 }
 0x6fa   :  { %v4448_v38 = vcombine.high %v4447_v5, %v4447_v5  ;;  %v4455_v39 = vrot.slane %v4447_v5, %v6674_v50 }
 0x6fc   :  { %v4462_v46 = vrot.slane %v4448_v38, %v6674_v50  ;;  %4466 = vst.msk [vmem:[%s7460_s7] sm:$0x1] %vm4465_vm9, %v4455_v39 }
 0x6fe   :  { %4467 = vst.msk [vmem:[%s7460_s7 + $0x1] sm:$0x1] %vm4465_vm9, %v4462_v46 }

</bundles_post_ra>
